<compile_context>
chip_gen: v7x
topology: tpu7x:2x2x1
jax: 0.10.0
libtpu: 0.0.40
codegen_flags: <defaults>
</compile_context>

<pallas_src>
import math
import functools

import jax
import jax.numpy as jnp
from jax.experimental import pallas as pl
from jax.experimental.pallas import tpu as pltpu

# ----------------------------- model hyper-params (small) -----------------------------
NTOKEN = 64     # vocabulary size
D_MODEL = 32    # embedding dim
NHEAD = 4       # attention heads
D_HID = 64      # feed-forward hidden dim
NLAYERS = 2     # encoder layers
SEQ = 8         # sequence length
BATCH = 2       # batch size

VPAD = 128      # lane-dense padding for the final projection / kernel output

# rows of the coalesced per-layer vector-parameter table [NLAYERS, NVEC, VPAD]
ROW_BQKV, ROW_BO = 0, 1          # fused qkv bias (96 lanes) / out-proj bias
ROW_G1, ROW_BE1 = 2, 3           # LayerNorm1 gamma / beta
ROW_B1, ROW_B2 = 4, 5            # FFN biases
ROW_G2, ROW_BE2 = 6, 7           # LayerNorm2 gamma / beta
NVEC = 8


# ----------------------------- shared math -----------------------------
def _layernorm(x, gamma, beta, eps=1e-5):
    mu = jnp.mean(x, axis=-1, keepdims=True)
    var = jnp.mean(jnp.square(x - mu), axis=-1, keepdims=True)
    return (x - mu) * jax.lax.rsqrt(var + eps) * gamma + beta


# ----------------------------- fused Pallas kernel -----------------------------
def fused_transformer_kernel(ids_ref, emb_ref, pe_ref, hm_ref, brow_ref, bcol_ref,
                             wqkv_ref, wo_ref, w1_ref, w2_ref, vecs_ref,
                             linw_ref, linb_ref, o_ref, *, nhead, nlayers):
    SB = ids_ref.shape[0]                     # S * B flattened tokens (row = s*B + b)
    V, D = emb_ref.shape
    DH = w1_ref.shape[-1]
    dh = D // nhead
    scale = 1.0 / math.sqrt(dh)

    # --- hoisted constants (computed once, reused by every layer) ---
    hm = hm_ref[...]                          # [nhead*SB, D] 0/1 head lane mask
    hm_scale = hm * scale                     # folds 1/sqrt(dh) into the stacked-Q mask
    attn_bias = jnp.where(brow_ref[...] == bcol_ref[...], 0.0, -1e9)   # [nhead*SB, SB]

    # --- embedding lookup fused as a one-hot matmul (table pre-scaled by sqrt(D)) + pos enc ---
    tok = jax.lax.broadcasted_iota(jnp.int32, (SB, V), 1)
    onehot = (tok == ids_ref[...]).astype(jnp.float32)                                   # [SB, V]
    x = jnp.dot(onehot.astype(jnp.bfloat16), emb_ref[...],
                preferred_element_type=jnp.float32) + pe_ref[...]                        # [SB, D]

    for l in range(nlayers):
        vec = vecs_ref[l]                                                                # [NVEC, VPAD]

        # --- fused QKV projection: one MXU push per layer ---
        qkv = jnp.dot(x.astype(jnp.bfloat16), wqkv_ref[l],
                      preferred_element_type=jnp.float32) + vec[ROW_BQKV:ROW_BQKV + 1, :3 * D]
        q = qkv[:, 0 * D:1 * D]
        k = qkv[:, 1 * D:2 * D]
        v = qkv[:, 2 * D:3 * D]

        # --- all heads at once: stacked lane-masked Q -> one score matmul, one softmax ---
        q_stack = jnp.concatenate([q] * nhead, axis=0) * hm_scale                        # [nhead*SB, D]
        s = jax.lax.dot_general(q_stack, k, (((1,), (1,)), ((), ())),
                                preferred_element_type=jnp.float32)                      # [nhead*SB, SB]
        s = s + attn_bias
        s = s - jnp.max(s, axis=-1, keepdims=True)
        p = jnp.exp(s)
        p = p * pl.reciprocal(jnp.sum(p, axis=-1, keepdims=True), approx=True)

        # --- one AV matmul, then masked sublane-block head recombination ---
        av = jnp.dot(p, v, preferred_element_type=jnp.float32) * hm                      # [nhead*SB, D]
        attn = av[0:SB]
        for h in range(1, nhead):
            attn = attn + av[h * SB:(h + 1) * SB]                                        # [SB, D]

        attn = jnp.dot(attn.astype(jnp.bfloat16), wo_ref[l],
                       preferred_element_type=jnp.float32) + vec[ROW_BO:ROW_BO + 1, :D]
        x = _layernorm(x + attn, vec[ROW_G1:ROW_G1 + 1, :D], vec[ROW_BE1:ROW_BE1 + 1, :D])

        # --- feed-forward (ReLU) ---
        ff = jnp.dot(x.astype(jnp.bfloat16), w1_ref[l],
                     preferred_element_type=jnp.float32) + vec[ROW_B1:ROW_B1 + 1, :DH]
        ff = jnp.maximum(ff, 0.0)
        ff = jnp.dot(ff.astype(jnp.bfloat16), w2_ref[l],
                     preferred_element_type=jnp.float32) + vec[ROW_B2:ROW_B2 + 1, :D]
        x = _layernorm(x + ff, vec[ROW_G2:ROW_G2 + 1, :D], vec[ROW_BE2:ROW_BE2 + 1, :D])

    # --- final linear, lane-dense (VPAD=128 wide) output stores ---
    o_ref[...] = jnp.dot(x.astype(jnp.bfloat16), linw_ref[...],
                         preferred_element_type=jnp.float32) + linb_ref[...]


# ----------------------------- wrapper -----------------------------
def transformer_forward(src, params):
    """src: int32 [S, B] -> logits [S, B, NTOKEN] (matches PyTorch forward, src_mask=None)."""
    S, B = src.shape
    SB = S * B
    ids = src.reshape(SB, 1).astype(jnp.int32)             # row = s * B + b

    args = (ids, params["embedding"], params["pe_slab"], params["hm_stack"],
            params["bids_row"], params["bids_col"],
            params["wqkv"], params["wo"], params["w1"], params["w2"],
            params["vecs"], params["lin_w"], params["lin_b"])

    def full_spec(a):
        nd = a.ndim
        return pl.BlockSpec(a.shape, lambda i, _nd=nd: (0,) * _nd)

    out = pl.pallas_call(
        functools.partial(fused_transformer_kernel, nhead=NHEAD, nlayers=NLAYERS),
        out_shape=jax.ShapeDtypeStruct((SB, VPAD), jnp.float32),
        grid=(1,),
        in_specs=[full_spec(a) for a in args],
        out_specs=pl.BlockSpec((SB, VPAD), lambda i: (0, 0)),
        compiler_params=pltpu.CompilerParams(dimension_semantics=("arbitrary",)),
    )(*args)
    return out[:, :NTOKEN].reshape(S, B, NTOKEN)


# ----------------------------- params -----------------------------
def make_positional_encoding(d_model, max_len):
    position = jnp.arange(max_len, dtype=jnp.float32)[:, None]
    div_term = jnp.exp(jnp.arange(0, d_model, 2, dtype=jnp.float32)
                       * (-math.log(10000.0) / d_model))
    pe = jnp.zeros((max_len, d_model), dtype=jnp.float32)
    pe = pe.at[:, 0::2].set(jnp.sin(position * div_term))
    pe = pe.at[:, 1::2].set(jnp.cos(position * div_term))
    return pe                                               # [max_len, d_model]


def init_params(key, seq=SEQ, batch=BATCH):
    ks = jax.random.split(key, 2 + NLAYERS)

    def u(k, shape, s=0.1):
        return jax.random.uniform(k, shape, jnp.float32, -s, s)

    SB = seq * batch
    dh = D_MODEL // NHEAD

    # constants prepared once for the fused kernel (tokens flattened as row = s*B + b)
    pe = make_positional_encoding(D_MODEL, max_len=512)
    pe_slab = jnp.repeat(pe[:seq], batch, axis=0)                               # [SB, D]

    # hoisted head lane masks: rows h*SB:(h+1)*SB select head h's dh lanes
    lane = jnp.arange(D_MODEL)[None, :]
    row = jnp.arange(NHEAD * SB)[:, None]
    hm_stack = ((lane // dh) == (row // SB)).astype(jnp.float32)                # [NHEAD*SB, D]

    # O(SB) batch-id vectors; the [NHEAD*SB, SB] additive mask is built in-kernel
    bids_col = (jnp.arange(SB, dtype=jnp.int32) % batch)[None, :]               # [1, SB]
    bids_row = jnp.tile(bids_col[0], NHEAD)[:, None]                            # [NHEAD*SB, 1]

    # embedding pre-scaled by sqrt(d_model); weights stored bf16 (single-pass MXU path)
    emb = (u(ks[0], (NTOKEN, D_MODEL)) * math.sqrt(D_MODEL)).astype(jnp.bfloat16)

    lin_w = jnp.zeros((D_MODEL, VPAD), jnp.float32).at[:, :NTOKEN].set(
        u(ks[1], (D_MODEL, NTOKEN))).astype(jnp.bfloat16)   # nn.Linear.weight^T, lane-padded

    wqkv, wo, w1, w2 = [], [], [], []
    for l in range(NLAYERS):
        lk = jax.random.split(ks[2 + l], 4)
        wqkv.append(u(lk[0], (D_MODEL, 3 * D_MODEL)))        # fused in_proj (q|k|v), transposed
        wo.append(u(lk[1], (D_MODEL, D_MODEL)))              # out_proj, transposed
        w1.append(u(lk[2], (D_MODEL, D_HID)))                # linear1, transposed
        w2.append(u(lk[3], (D_HID, D_MODEL)))                # linear2, transposed

    # coalesced per-layer vectors: biases (zero) + LayerNorm gamma (one) / beta (zero)
    vecs = jnp.zeros((NLAYERS, NVEC, VPAD), jnp.float32)
    vecs = vecs.at[:, ROW_G1, :D_MODEL].set(1.0)
    vecs = vecs.at[:, ROW_G2, :D_MODEL].set(1.0)

    return {
        "embedding": emb,                                    # [V, D] bf16, pre-scaled by sqrt(D)
        "pe_slab": pe_slab,                                  # [SB, D] f32
        "hm_stack": hm_stack,                                # [NHEAD*SB, D] f32
        "bids_row": bids_row,                                # [NHEAD*SB, 1] i32
        "bids_col": bids_col,                                # [1, SB] i32
        "wqkv": jnp.stack(wqkv).astype(jnp.bfloat16),        # [L, D, 3D]
        "wo": jnp.stack(wo).astype(jnp.bfloat16),            # [L, D, D]
        "w1": jnp.stack(w1).astype(jnp.bfloat16),            # [L, D, D_HID]
        "w2": jnp.stack(w2).astype(jnp.bfloat16),            # [L, D_HID, D]
        "vecs": vecs,                                        # [L, NVEC, VPAD] f32
        "lin_w": lin_w,                                      # [D, VPAD] bf16
        "lin_b": jnp.zeros((1, VPAD), jnp.float32),          # nn.Linear.bias (zeroed), lane-padded
    }


# ----------------------------- pure-JAX reference (cross-check) -----------------------------
def reference_forward(src, params):
    S, B = src.shape
    D, dh = D_MODEL, D_MODEL // NHEAD
    hp = jax.lax.Precision.HIGHEST

    emb = params["embedding"].astype(jnp.float32)            # already scaled by sqrt(D)
    x = emb[src.reshape(-1)] + params["pe_slab"]                                  # [S*B, D]
    col = jnp.arange(S * B) % B
    bias = jnp.where(col[:, None] == col[None, :], 0.0, -1e9)
    for l in range(NLAYERS):
        vec = params["vecs"][l]
        wqkv = params["wqkv"][l].astype(jnp.float32)
        bqkv = vec[ROW_BQKV, :3 * D]
        q = jnp.dot(x, wqkv[:, 0:D], precision=hp) + bqkv[0:D]
        k = jnp.dot(x, wqkv[:, D:2 * D], precision=hp) + bqkv[D:2 * D]
        v = jnp.dot(x, wqkv[:, 2 * D:3 * D], precision=hp) + bqkv[2 * D:3 * D]
        heads = []
        for h in range(NHEAD):
            qh = q[:, h * dh:(h + 1) * dh] / math.sqrt(dh)
            kh = k[:, h * dh:(h + 1) * dh]
            vh = v[:, h * dh:(h + 1) * dh]
            s = jnp.dot(qh, kh.T, precision=hp) + bias
            heads.append(jnp.dot(jax.nn.softmax(s, axis=-1), vh, precision=hp))
        attn = jnp.dot(jnp.concatenate(heads, -1), params["wo"][l].astype(jnp.float32),
                       precision=hp) + vec[ROW_BO, :D]
        x = _layernorm(x + attn, vec[ROW_G1, :D], vec[ROW_BE1, :D])
        ff = jax.nn.relu(jnp.dot(x, params["w1"][l].astype(jnp.float32), precision=hp)
                         + vec[ROW_B1, :D_HID])
        ff = jnp.dot(ff, params["w2"][l].astype(jnp.float32), precision=hp) + vec[ROW_B2, :D]
        x = _layernorm(x + ff, vec[ROW_G2, :D], vec[ROW_BE2, :D])
    out = jnp.dot(x, params["lin_w"].astype(jnp.float32), precision=hp) + params["lin_b"]
    return out[:, :NTOKEN].reshape(S, B, NTOKEN)


# ----------------------------- main -----------------------------
if __name__ == "__main__":
    key = jax.random.PRNGKey(0)
    k_param, k_src = jax.random.split(key)
    params = init_params(k_param)
    src = jax.random.randint(k_src, (SEQ, BATCH), 0, NTOKEN, dtype=jnp.int32)

    fwd = jax.jit(transformer_forward)
    out = jax.block_until_ready(fwd(src, params))

    assert out.shape == (SEQ, BATCH, NTOKEN), out.shape
    assert bool(jnp.all(jnp.isfinite(out)))
    ref = reference_forward(src, params)
    assert float(jnp.max(jnp.abs(out - ref))) < 5e-2
    print("KERNEL_OK")
</pallas_src>

<mosaic_0001>
module attributes {stable_mosaic.version = 11 : i64} {
  func.func @fused_transformer_kernel(%arg0: i32, %arg1: memref<16x1xi32, #tpu.memory_space<vmem>>, %arg2: memref<64x32xbf16, #tpu.memory_space<vmem>>, %arg3: memref<16x32xf32, #tpu.memory_space<vmem>>, %arg4: memref<64x32xf32, #tpu.memory_space<vmem>>, %arg5: memref<64x1xi32, #tpu.memory_space<vmem>>, %arg6: memref<1x16xi32, #tpu.memory_space<vmem>>, %arg7: memref<2x32x96xbf16, #tpu.memory_space<vmem>>, %arg8: memref<2x32x32xbf16, #tpu.memory_space<vmem>>, %arg9: memref<2x32x64xbf16, #tpu.memory_space<vmem>>, %arg10: memref<2x64x32xbf16, #tpu.memory_space<vmem>>, %arg11: memref<2x8x128xf32, #tpu.memory_space<vmem>>, %arg12: memref<32x128xbf16, #tpu.memory_space<vmem>>, %arg13: memref<1x128xf32, #tpu.memory_space<vmem>>, %arg14: memref<16x128xf32, #tpu.memory_space<vmem>>) attributes {dimension_semantics = [#tpu.dimension_semantics<arbitrary>], iteration_bounds = array<i64: 1>, scalar_prefetch = 0 : i64, scratch_operands = 0 : i64, tpu.core_type = #tpu.core_type<tc>, window_params = [{pipeline_mode = #tpu.pipeline_mode<synchronous>, transform_indices = @transform_0, window_bounds = array<i64: 16, 1>}, {pipeline_mode = #tpu.pipeline_mode<synchronous>, transform_indices = @transform_1, window_bounds = array<i64: 64, 32>}, {pipeline_mode = #tpu.pipeline_mode<synchronous>, transform_indices = @transform_2, window_bounds = array<i64: 16, 32>}, {pipeline_mode = #tpu.pipeline_mode<synchronous>, transform_indices = @transform_3, window_bounds = array<i64: 64, 32>}, {pipeline_mode = #tpu.pipeline_mode<synchronous>, transform_indices = @transform_4, window_bounds = array<i64: 64, 1>}, {pipeline_mode = #tpu.pipeline_mode<synchronous>, transform_indices = @transform_5, window_bounds = array<i64: 1, 16>}, {pipeline_mode = #tpu.pipeline_mode<synchronous>, transform_indices = @transform_6, window_bounds = array<i64: 2, 32, 96>}, {pipeline_mode = #tpu.pipeline_mode<synchronous>, transform_indices = @transform_7, window_bounds = array<i64: 2, 32, 32>}, {pipeline_mode = #tpu.pipeline_mode<synchronous>, transform_indices = @transform_8, window_bounds = array<i64: 2, 32, 64>}, {pipeline_mode = #tpu.pipeline_mode<synchronous>, transform_indices = @transform_9, window_bounds = array<i64: 2, 64, 32>}, {pipeline_mode = #tpu.pipeline_mode<synchronous>, transform_indices = @transform_10, window_bounds = array<i64: 2, 8, 128>}, {pipeline_mode = #tpu.pipeline_mode<synchronous>, transform_indices = @transform_11, window_bounds = array<i64: 32, 128>}, {pipeline_mode = #tpu.pipeline_mode<synchronous>, transform_indices = @transform_12, window_bounds = array<i64: 1, 128>}, {pipeline_mode = #tpu.pipeline_mode<synchronous>, transform_indices = @transform_13, window_bounds = array<i64: 16, 128>}]} {
    %c0 = arith.constant 0 : index
    %c0_0 = arith.constant 0 : index
    %0 = vector.load %arg4[%c0, %c0_0] : memref<64x32xf32, #tpu.memory_space<vmem>>, vector<64x32xf32>
    %cst = arith.constant 0.353553385 : f32
    %1 = vector.broadcast %cst : f32 to vector<64x32xf32>
    %2 = arith.mulf %0, %1 : vector<64x32xf32>
    %c0_1 = arith.constant 0 : index
    %c0_2 = arith.constant 0 : index
    %3 = vector.load %arg5[%c0_1, %c0_2] : memref<64x1xi32, #tpu.memory_space<vmem>>, vector<64x1xi32>
    %c0_3 = arith.constant 0 : index
    %c0_4 = arith.constant 0 : index
    %4 = vector.load %arg6[%c0_3, %c0_4] : memref<1x16xi32, #tpu.memory_space<vmem>>, vector<1x16xi32>
    %5 = vector.broadcast %3 : vector<64x1xi32> to vector<64x16xi32>
    %6 = vector.broadcast %4 : vector<1x16xi32> to vector<64x16xi32>
    %7 = arith.cmpi eq, %5, %6 : vector<64x16xi32>
    %cst_5 = arith.constant 0.000000e+00 : f32
    %cst_6 = arith.constant -1.000000e+09 : f32
    %8 = vector.broadcast %cst_5 : f32 to vector<64x16xf32>
    %9 = vector.broadcast %cst_6 : f32 to vector<64x16xf32>
    %10 = arith.select %7, %8, %9 : vector<64x16xi1>, vector<64x16xf32>
    %11 = tpu.iota {dimensions = array<i32: 1>} : vector<16x64xi32>
    %c0_7 = arith.constant 0 : index
    %c0_8 = arith.constant 0 : index
    %12 = vector.load %arg1[%c0_7, %c0_8] : memref<16x1xi32, #tpu.memory_space<vmem>>, vector<16x1xi32>
    %13 = vector.broadcast %12 : vector<16x1xi32> to vector<16x64xi32>
    %14 = arith.cmpi eq, %11, %13 : vector<16x64xi32>
    %15 = arith.extui %14 : vector<16x64xi1> to vector<16x64xi32>
    %16 = arith.sitofp %15 : vector<16x64xi32> to vector<16x64xf32>
    %17 = arith.truncf %16 : vector<16x64xf32> to vector<16x64xbf16>
    %c0_9 = arith.constant 0 : index
    %c0_10 = arith.constant 0 : index
    %18 = vector.load %arg2[%c0_9, %c0_10] : memref<64x32xbf16, #tpu.memory_space<vmem>>, vector<64x32xbf16>
    %cst_11 = arith.constant dense<0.000000e+00> : vector<16x32xf32>
    %19 = tpu.matmul %17, %18, %cst_11 {dimension_numbers = #tpu.dot_dimension_numbers<[1], [0], [0], [1], [0, 0, 1, 1], [], []>} : vector<16x64xbf16>, vector<64x32xbf16>, vector<16x32xf32> -> vector<16x32xf32>
    %c0_12 = arith.constant 0 : index
    %c0_13 = arith.constant 0 : index
    %20 = vector.load %arg3[%c0_12, %c0_13] : memref<16x32xf32, #tpu.memory_space<vmem>>, vector<16x32xf32>
    %21 = arith.addf %19, %20 : vector<16x32xf32>
    %c0_14 = arith.constant 0 : index
    %c0_15 = arith.constant 0 : index
    %c0_16 = arith.constant 0 : index
    %22 = vector.load %arg11[%c0_14, %c0_15, %c0_16] : memref<2x8x128xf32, #tpu.memory_space<vmem>>, vector<1x8x128xf32>
    %23 = vector.shape_cast %22 : vector<1x8x128xf32> to vector<8x128xf32>
    %24 = arith.truncf %21 : vector<16x32xf32> to vector<16x32xbf16>
    %c0_17 = arith.constant 0 : index
    %c0_18 = arith.constant 0 : index
    %c0_19 = arith.constant 0 : index
    %25 = vector.load %arg7[%c0_17, %c0_18, %c0_19] : memref<2x32x96xbf16, #tpu.memory_space<vmem>>, vector<1x32x96xbf16>
    %26 = vector.shape_cast %25 : vector<1x32x96xbf16> to vector<32x96xbf16>
    %cst_20 = arith.constant dense<0.000000e+00> : vector<16x96xf32>
    %27 = tpu.matmul %24, %26, %cst_20 {dimension_numbers = #tpu.dot_dimension_numbers<[1], [0], [0], [1], [0, 0, 1, 1], [], []>} : vector<16x32xbf16>, vector<32x96xbf16>, vector<16x96xf32> -> vector<16x96xf32>
    %28 = vector.extract_strided_slice %23 {offsets = [0, 0], sizes = [1, 96], strides = [1, 1]} : vector<8x128xf32> to vector<1x96xf32>
    %29 = vector.broadcast %28 : vector<1x96xf32> to vector<16x96xf32>
    %30 = arith.addf %27, %29 : vector<16x96xf32>
    %31 = vector.extract_strided_slice %30 {offsets = [0, 0], sizes = [16, 32], strides = [1, 1]} : vector<16x96xf32> to vector<16x32xf32>
    %32 = vector.extract_strided_slice %30 {offsets = [0, 32], sizes = [16, 32], strides = [1, 1]} : vector<16x96xf32> to vector<16x32xf32>
    %33 = vector.extract_strided_slice %30 {offsets = [0, 64], sizes = [16, 32], strides = [1, 1]} : vector<16x96xf32> to vector<16x32xf32>
    %34 = tpu.concatenate %31, %31, %31, %31 in 0 : vector<16x32xf32>, vector<16x32xf32>, vector<16x32xf32>, vector<16x32xf32> -> vector<64x32xf32>
    %35 = arith.mulf %34, %2 : vector<64x32xf32>
    %cst_21 = arith.constant dense<0.000000e+00> : vector<64x16xf32>
    %36 = tpu.matmul %35, %32, %cst_21 {dimension_numbers = #tpu.dot_dimension_numbers<[1], [1], [0], [0], [0, 0, 1, 0], [], []>} : vector<64x32xf32>, vector<16x32xf32>, vector<64x16xf32> -> vector<64x16xf32>
    %37 = arith.addf %36, %10 : vector<64x16xf32>
    %cst_22 = arith.constant dense<0xFF800000> : vector<64xf32>
    %38 = vector.multi_reduction <maximumf>, %37, %cst_22 [1] : vector<64x16xf32> to vector<64xf32>
    %39 = vector.shape_cast %38 : vector<64xf32> to vector<64x1xf32>
    %40 = vector.broadcast %39 : vector<64x1xf32> to vector<64x16xf32>
    %41 = arith.subf %37, %40 : vector<64x16xf32>
    %42 = math.exp %41 : vector<64x16xf32>
    %cst_23 = arith.constant dense<0.000000e+00> : vector<64xf32>
    %43 = vector.multi_reduction <add>, %42, %cst_23 [1] : vector<64x16xf32> to vector<64xf32>
    %44 = vector.shape_cast %43 : vector<64xf32> to vector<64x1xf32>
    %45 = tpu.reciprocal %44 {approx = true} : vector<64x1xf32> -> vector<64x1xf32>
    %46 = vector.broadcast %45 : vector<64x1xf32> to vector<64x16xf32>
    %47 = arith.mulf %42, %46 : vector<64x16xf32>
    %cst_24 = arith.constant dense<0.000000e+00> : vector<64x32xf32>
    %48 = tpu.matmul %47, %33, %cst_24 {dimension_numbers = #tpu.dot_dimension_numbers<[1], [0], [0], [1], [0, 0, 1, 1], [], []>} : vector<64x16xf32>, vector<16x32xf32>, vector<64x32xf32> -> vector<64x32xf32>
    %49 = arith.mulf %48, %0 : vector<64x32xf32>
    %50 = vector.extract_strided_slice %49 {offsets = [0, 0], sizes = [16, 32], strides = [1, 1]} : vector<64x32xf32> to vector<16x32xf32>
    %51 = vector.extract_strided_slice %49 {offsets = [16, 0], sizes = [16, 32], strides = [1, 1]} : vector<64x32xf32> to vector<16x32xf32>
    %52 = arith.addf %50, %51 : vector<16x32xf32>
    %53 = vector.extract_strided_slice %49 {offsets = [32, 0], sizes = [16, 32], strides = [1, 1]} : vector<64x32xf32> to vector<16x32xf32>
    %54 = arith.addf %52, %53 : vector<16x32xf32>
    %55 = vector.extract_strided_slice %49 {offsets = [48, 0], sizes = [16, 32], strides = [1, 1]} : vector<64x32xf32> to vector<16x32xf32>
    %56 = arith.addf %54, %55 : vector<16x32xf32>
    %57 = arith.truncf %56 : vector<16x32xf32> to vector<16x32xbf16>
    %c0_25 = arith.constant 0 : index
    %c0_26 = arith.constant 0 : index
    %c0_27 = arith.constant 0 : index
    %58 = vector.load %arg8[%c0_25, %c0_26, %c0_27] : memref<2x32x32xbf16, #tpu.memory_space<vmem>>, vector<1x32x32xbf16>
    %59 = vector.shape_cast %58 : vector<1x32x32xbf16> to vector<32x32xbf16>
    %cst_28 = arith.constant dense<0.000000e+00> : vector<16x32xf32>
    %60 = tpu.matmul %57, %59, %cst_28 {dimension_numbers = #tpu.dot_dimension_numbers<[1], [0], [0], [1], [0, 0, 1, 1], [], []>} : vector<16x32xbf16>, vector<32x32xbf16>, vector<16x32xf32> -> vector<16x32xf32>
    %61 = vector.extract_strided_slice %23 {offsets = [1, 0], sizes = [1, 32], strides = [1, 1]} : vector<8x128xf32> to vector<1x32xf32>
    %62 = vector.broadcast %61 : vector<1x32xf32> to vector<16x32xf32>
    %63 = arith.addf %60, %62 : vector<16x32xf32>
    %64 = arith.addf %21, %63 : vector<16x32xf32>
    %65 = vector.extract_strided_slice %23 {offsets = [2, 0], sizes = [1, 32], strides = [1, 1]} : vector<8x128xf32> to vector<1x32xf32>
    %66 = vector.extract_strided_slice %23 {offsets = [3, 0], sizes = [1, 32], strides = [1, 1]} : vector<8x128xf32> to vector<1x32xf32>
    %cst_29 = arith.constant dense<0.000000e+00> : vector<16xf32>
    %67 = vector.multi_reduction <add>, %64, %cst_29 [1] : vector<16x32xf32> to vector<16xf32>
    %68 = vector.shape_cast %67 : vector<16xf32> to vector<16x1xf32>
    %cst_30 = arith.constant 3.200000e+01 : f32
    %69 = vector.broadcast %cst_30 : f32 to vector<16x1xf32>
    %70 = arith.divf %68, %69 : vector<16x1xf32>
    %71 = vector.broadcast %70 : vector<16x1xf32> to vector<16x32xf32>
    %72 = arith.subf %64, %71 : vector<16x32xf32>
    %73 = arith.mulf %72, %72 : vector<16x32xf32>
    %cst_31 = arith.constant dense<0.000000e+00> : vector<16xf32>
    %74 = vector.multi_reduction <add>, %73, %cst_31 [1] : vector<16x32xf32> to vector<16xf32>
    %75 = vector.shape_cast %74 : vector<16xf32> to vector<16x1xf32>
    %cst_32 = arith.constant 3.200000e+01 : f32
    %76 = vector.broadcast %cst_32 : f32 to vector<16x1xf32>
    %77 = arith.divf %75, %76 : vector<16x1xf32>
    %78 = vector.broadcast %70 : vector<16x1xf32> to vector<16x32xf32>
    %79 = arith.subf %64, %78 : vector<16x32xf32>
    %cst_33 = arith.constant 9.99999974E-6 : f32
    %80 = vector.broadcast %cst_33 : f32 to vector<16x1xf32>
    %81 = arith.addf %77, %80 : vector<16x1xf32>
    %82 = math.rsqrt %81 : vector<16x1xf32>
    %83 = vector.broadcast %82 : vector<16x1xf32> to vector<16x32xf32>
    %84 = arith.mulf %79, %83 : vector<16x32xf32>
    %85 = vector.broadcast %65 : vector<1x32xf32> to vector<16x32xf32>
    %86 = arith.mulf %84, %85 : vector<16x32xf32>
    %87 = vector.broadcast %66 : vector<1x32xf32> to vector<16x32xf32>
    %88 = arith.addf %86, %87 : vector<16x32xf32>
    %89 = arith.truncf %88 : vector<16x32xf32> to vector<16x32xbf16>
    %c0_34 = arith.constant 0 : index
    %c0_35 = arith.constant 0 : index
    %c0_36 = arith.constant 0 : index
    %90 = vector.load %arg9[%c0_34, %c0_35, %c0_36] : memref<2x32x64xbf16, #tpu.memory_space<vmem>>, vector<1x32x64xbf16>
    %91 = vector.shape_cast %90 : vector<1x32x64xbf16> to vector<32x64xbf16>
    %cst_37 = arith.constant dense<0.000000e+00> : vector<16x64xf32>
    %92 = tpu.matmul %89, %91, %cst_37 {dimension_numbers = #tpu.dot_dimension_numbers<[1], [0], [0], [1], [0, 0, 1, 1], [], []>} : vector<16x32xbf16>, vector<32x64xbf16>, vector<16x64xf32> -> vector<16x64xf32>
    %93 = vector.extract_strided_slice %23 {offsets = [4, 0], sizes = [1, 64], strides = [1, 1]} : vector<8x128xf32> to vector<1x64xf32>
    %94 = vector.broadcast %93 : vector<1x64xf32> to vector<16x64xf32>
    %95 = arith.addf %92, %94 : vector<16x64xf32>
    %cst_38 = arith.constant 0.000000e+00 : f32
    %96 = vector.broadcast %cst_38 : f32 to vector<16x64xf32>
    %97 = arith.maximumf %95, %96 : vector<16x64xf32>
    %98 = arith.truncf %97 : vector<16x64xf32> to vector<16x64xbf16>
    %c0_39 = arith.constant 0 : index
    %c0_40 = arith.constant 0 : index
    %c0_41 = arith.constant 0 : index
    %99 = vector.load %arg10[%c0_39, %c0_40, %c0_41] : memref<2x64x32xbf16, #tpu.memory_space<vmem>>, vector<1x64x32xbf16>
    %100 = vector.shape_cast %99 : vector<1x64x32xbf16> to vector<64x32xbf16>
    %cst_42 = arith.constant dense<0.000000e+00> : vector<16x32xf32>
    %101 = tpu.matmul %98, %100, %cst_42 {dimension_numbers = #tpu.dot_dimension_numbers<[1], [0], [0], [1], [0, 0, 1, 1], [], []>} : vector<16x64xbf16>, vector<64x32xbf16>, vector<16x32xf32> -> vector<16x32xf32>
    %102 = vector.extract_strided_slice %23 {offsets = [5, 0], sizes = [1, 32], strides = [1, 1]} : vector<8x128xf32> to vector<1x32xf32>
    %103 = vector.broadcast %102 : vector<1x32xf32> to vector<16x32xf32>
    %104 = arith.addf %101, %103 : vector<16x32xf32>
    %105 = arith.addf %88, %104 : vector<16x32xf32>
    %106 = vector.extract_strided_slice %23 {offsets = [6, 0], sizes = [1, 32], strides = [1, 1]} : vector<8x128xf32> to vector<1x32xf32>
    %107 = vector.extract_strided_slice %23 {offsets = [7, 0], sizes = [1, 32], strides = [1, 1]} : vector<8x128xf32> to vector<1x32xf32>
    %cst_43 = arith.constant dense<0.000000e+00> : vector<16xf32>
    %108 = vector.multi_reduction <add>, %105, %cst_43 [1] : vector<16x32xf32> to vector<16xf32>
    %109 = vector.shape_cast %108 : vector<16xf32> to vector<16x1xf32>
    %cst_44 = arith.constant 3.200000e+01 : f32
    %110 = vector.broadcast %cst_44 : f32 to vector<16x1xf32>
    %111 = arith.divf %109, %110 : vector<16x1xf32>
    %112 = vector.broadcast %111 : vector<16x1xf32> to vector<16x32xf32>
    %113 = arith.subf %105, %112 : vector<16x32xf32>
    %114 = arith.mulf %113, %113 : vector<16x32xf32>
    %cst_45 = arith.constant dense<0.000000e+00> : vector<16xf32>
    %115 = vector.multi_reduction <add>, %114, %cst_45 [1] : vector<16x32xf32> to vector<16xf32>
    %116 = vector.shape_cast %115 : vector<16xf32> to vector<16x1xf32>
    %cst_46 = arith.constant 3.200000e+01 : f32
    %117 = vector.broadcast %cst_46 : f32 to vector<16x1xf32>
    %118 = arith.divf %116, %117 : vector<16x1xf32>
    %119 = vector.broadcast %111 : vector<16x1xf32> to vector<16x32xf32>
    %120 = arith.subf %105, %119 : vector<16x32xf32>
    %cst_47 = arith.constant 9.99999974E-6 : f32
    %121 = vector.broadcast %cst_47 : f32 to vector<16x1xf32>
    %122 = arith.addf %118, %121 : vector<16x1xf32>
    %123 = math.rsqrt %122 : vector<16x1xf32>
    %124 = vector.broadcast %123 : vector<16x1xf32> to vector<16x32xf32>
    %125 = arith.mulf %120, %124 : vector<16x32xf32>
    %126 = vector.broadcast %106 : vector<1x32xf32> to vector<16x32xf32>
    %127 = arith.mulf %125, %126 : vector<16x32xf32>
    %128 = vector.broadcast %107 : vector<1x32xf32> to vector<16x32xf32>
    %129 = arith.addf %127, %128 : vector<16x32xf32>
    %c1 = arith.constant 1 : index
    %c0_48 = arith.constant 0 : index
    %c0_49 = arith.constant 0 : index
    %130 = vector.load %arg11[%c1, %c0_48, %c0_49] : memref<2x8x128xf32, #tpu.memory_space<vmem>>, vector<1x8x128xf32>
    %131 = vector.shape_cast %130 : vector<1x8x128xf32> to vector<8x128xf32>
    %132 = arith.truncf %129 : vector<16x32xf32> to vector<16x32xbf16>
    %c1_50 = arith.constant 1 : index
    %c0_51 = arith.constant 0 : index
    %c0_52 = arith.constant 0 : index
    %133 = vector.load %arg7[%c1_50, %c0_51, %c0_52] : memref<2x32x96xbf16, #tpu.memory_space<vmem>>, vector<1x32x96xbf16>
    %134 = vector.shape_cast %133 : vector<1x32x96xbf16> to vector<32x96xbf16>
    %cst_53 = arith.constant dense<0.000000e+00> : vector<16x96xf32>
    %135 = tpu.matmul %132, %134, %cst_53 {dimension_numbers = #tpu.dot_dimension_numbers<[1], [0], [0], [1], [0, 0, 1, 1], [], []>} : vector<16x32xbf16>, vector<32x96xbf16>, vector<16x96xf32> -> vector<16x96xf32>
    %136 = vector.extract_strided_slice %131 {offsets = [0, 0], sizes = [1, 96], strides = [1, 1]} : vector<8x128xf32> to vector<1x96xf32>
    %137 = vector.broadcast %136 : vector<1x96xf32> to vector<16x96xf32>
    %138 = arith.addf %135, %137 : vector<16x96xf32>
    %139 = vector.extract_strided_slice %138 {offsets = [0, 0], sizes = [16, 32], strides = [1, 1]} : vector<16x96xf32> to vector<16x32xf32>
    %140 = vector.extract_strided_slice %138 {offsets = [0, 32], sizes = [16, 32], strides = [1, 1]} : vector<16x96xf32> to vector<16x32xf32>
    %141 = vector.extract_strided_slice %138 {offsets = [0, 64], sizes = [16, 32], strides = [1, 1]} : vector<16x96xf32> to vector<16x32xf32>
    %142 = tpu.concatenate %139, %139, %139, %139 in 0 : vector<16x32xf32>, vector<16x32xf32>, vector<16x32xf32>, vector<16x32xf32> -> vector<64x32xf32>
    %143 = arith.mulf %142, %2 : vector<64x32xf32>
    %cst_54 = arith.constant dense<0.000000e+00> : vector<64x16xf32>
    %144 = tpu.matmul %143, %140, %cst_54 {dimension_numbers = #tpu.dot_dimension_numbers<[1], [1], [0], [0], [0, 0, 1, 0], [], []>} : vector<64x32xf32>, vector<16x32xf32>, vector<64x16xf32> -> vector<64x16xf32>
    %145 = arith.addf %144, %10 : vector<64x16xf32>
    %cst_55 = arith.constant dense<0xFF800000> : vector<64xf32>
    %146 = vector.multi_reduction <maximumf>, %145, %cst_55 [1] : vector<64x16xf32> to vector<64xf32>
    %147 = vector.shape_cast %146 : vector<64xf32> to vector<64x1xf32>
    %148 = vector.broadcast %147 : vector<64x1xf32> to vector<64x16xf32>
    %149 = arith.subf %145, %148 : vector<64x16xf32>
    %150 = math.exp %149 : vector<64x16xf32>
    %cst_56 = arith.constant dense<0.000000e+00> : vector<64xf32>
    %151 = vector.multi_reduction <add>, %150, %cst_56 [1] : vector<64x16xf32> to vector<64xf32>
    %152 = vector.shape_cast %151 : vector<64xf32> to vector<64x1xf32>
    %153 = tpu.reciprocal %152 {approx = true} : vector<64x1xf32> -> vector<64x1xf32>
    %154 = vector.broadcast %153 : vector<64x1xf32> to vector<64x16xf32>
    %155 = arith.mulf %150, %154 : vector<64x16xf32>
    %cst_57 = arith.constant dense<0.000000e+00> : vector<64x32xf32>
    %156 = tpu.matmul %155, %141, %cst_57 {dimension_numbers = #tpu.dot_dimension_numbers<[1], [0], [0], [1], [0, 0, 1, 1], [], []>} : vector<64x16xf32>, vector<16x32xf32>, vector<64x32xf32> -> vector<64x32xf32>
    %157 = arith.mulf %156, %0 : vector<64x32xf32>
    %158 = vector.extract_strided_slice %157 {offsets = [0, 0], sizes = [16, 32], strides = [1, 1]} : vector<64x32xf32> to vector<16x32xf32>
    %159 = vector.extract_strided_slice %157 {offsets = [16, 0], sizes = [16, 32], strides = [1, 1]} : vector<64x32xf32> to vector<16x32xf32>
    %160 = arith.addf %158, %159 : vector<16x32xf32>
    %161 = vector.extract_strided_slice %157 {offsets = [32, 0], sizes = [16, 32], strides = [1, 1]} : vector<64x32xf32> to vector<16x32xf32>
    %162 = arith.addf %160, %161 : vector<16x32xf32>
    %163 = vector.extract_strided_slice %157 {offsets = [48, 0], sizes = [16, 32], strides = [1, 1]} : vector<64x32xf32> to vector<16x32xf32>
    %164 = arith.addf %162, %163 : vector<16x32xf32>
    %165 = arith.truncf %164 : vector<16x32xf32> to vector<16x32xbf16>
    %c1_58 = arith.constant 1 : index
    %c0_59 = arith.constant 0 : index
    %c0_60 = arith.constant 0 : index
    %166 = vector.load %arg8[%c1_58, %c0_59, %c0_60] : memref<2x32x32xbf16, #tpu.memory_space<vmem>>, vector<1x32x32xbf16>
    %167 = vector.shape_cast %166 : vector<1x32x32xbf16> to vector<32x32xbf16>
    %cst_61 = arith.constant dense<0.000000e+00> : vector<16x32xf32>
    %168 = tpu.matmul %165, %167, %cst_61 {dimension_numbers = #tpu.dot_dimension_numbers<[1], [0], [0], [1], [0, 0, 1, 1], [], []>} : vector<16x32xbf16>, vector<32x32xbf16>, vector<16x32xf32> -> vector<16x32xf32>
    %169 = vector.extract_strided_slice %131 {offsets = [1, 0], sizes = [1, 32], strides = [1, 1]} : vector<8x128xf32> to vector<1x32xf32>
    %170 = vector.broadcast %169 : vector<1x32xf32> to vector<16x32xf32>
    %171 = arith.addf %168, %170 : vector<16x32xf32>
    %172 = arith.addf %129, %171 : vector<16x32xf32>
    %173 = vector.extract_strided_slice %131 {offsets = [2, 0], sizes = [1, 32], strides = [1, 1]} : vector<8x128xf32> to vector<1x32xf32>
    %174 = vector.extract_strided_slice %131 {offsets = [3, 0], sizes = [1, 32], strides = [1, 1]} : vector<8x128xf32> to vector<1x32xf32>
    %cst_62 = arith.constant dense<0.000000e+00> : vector<16xf32>
    %175 = vector.multi_reduction <add>, %172, %cst_62 [1] : vector<16x32xf32> to vector<16xf32>
    %176 = vector.shape_cast %175 : vector<16xf32> to vector<16x1xf32>
    %cst_63 = arith.constant 3.200000e+01 : f32
    %177 = vector.broadcast %cst_63 : f32 to vector<16x1xf32>
    %178 = arith.divf %176, %177 : vector<16x1xf32>
    %179 = vector.broadcast %178 : vector<16x1xf32> to vector<16x32xf32>
    %180 = arith.subf %172, %179 : vector<16x32xf32>
    %181 = arith.mulf %180, %180 : vector<16x32xf32>
    %cst_64 = arith.constant dense<0.000000e+00> : vector<16xf32>
    %182 = vector.multi_reduction <add>, %181, %cst_64 [1] : vector<16x32xf32> to vector<16xf32>
    %183 = vector.shape_cast %182 : vector<16xf32> to vector<16x1xf32>
    %cst_65 = arith.constant 3.200000e+01 : f32
    %184 = vector.broadcast %cst_65 : f32 to vector<16x1xf32>
    %185 = arith.divf %183, %184 : vector<16x1xf32>
    %186 = vector.broadcast %178 : vector<16x1xf32> to vector<16x32xf32>
    %187 = arith.subf %172, %186 : vector<16x32xf32>
    %cst_66 = arith.constant 9.99999974E-6 : f32
    %188 = vector.broadcast %cst_66 : f32 to vector<16x1xf32>
    %189 = arith.addf %185, %188 : vector<16x1xf32>
    %190 = math.rsqrt %189 : vector<16x1xf32>
    %191 = vector.broadcast %190 : vector<16x1xf32> to vector<16x32xf32>
    %192 = arith.mulf %187, %191 : vector<16x32xf32>
    %193 = vector.broadcast %173 : vector<1x32xf32> to vector<16x32xf32>
    %194 = arith.mulf %192, %193 : vector<16x32xf32>
    %195 = vector.broadcast %174 : vector<1x32xf32> to vector<16x32xf32>
    %196 = arith.addf %194, %195 : vector<16x32xf32>
    %197 = arith.truncf %196 : vector<16x32xf32> to vector<16x32xbf16>
    %c1_67 = arith.constant 1 : index
    %c0_68 = arith.constant 0 : index
    %c0_69 = arith.constant 0 : index
    %198 = vector.load %arg9[%c1_67, %c0_68, %c0_69] : memref<2x32x64xbf16, #tpu.memory_space<vmem>>, vector<1x32x64xbf16>
    %199 = vector.shape_cast %198 : vector<1x32x64xbf16> to vector<32x64xbf16>
    %cst_70 = arith.constant dense<0.000000e+00> : vector<16x64xf32>
    %200 = tpu.matmul %197, %199, %cst_70 {dimension_numbers = #tpu.dot_dimension_numbers<[1], [0], [0], [1], [0, 0, 1, 1], [], []>} : vector<16x32xbf16>, vector<32x64xbf16>, vector<16x64xf32> -> vector<16x64xf32>
    %201 = vector.extract_strided_slice %131 {offsets = [4, 0], sizes = [1, 64], strides = [1, 1]} : vector<8x128xf32> to vector<1x64xf32>
    %202 = vector.broadcast %201 : vector<1x64xf32> to vector<16x64xf32>
    %203 = arith.addf %200, %202 : vector<16x64xf32>
    %cst_71 = arith.constant 0.000000e+00 : f32
    %204 = vector.broadcast %cst_71 : f32 to vector<16x64xf32>
    %205 = arith.maximumf %203, %204 : vector<16x64xf32>
    %206 = arith.truncf %205 : vector<16x64xf32> to vector<16x64xbf16>
    %c1_72 = arith.constant 1 : index
    %c0_73 = arith.constant 0 : index
    %c0_74 = arith.constant 0 : index
    %207 = vector.load %arg10[%c1_72, %c0_73, %c0_74] : memref<2x64x32xbf16, #tpu.memory_space<vmem>>, vector<1x64x32xbf16>
    %208 = vector.shape_cast %207 : vector<1x64x32xbf16> to vector<64x32xbf16>
    %cst_75 = arith.constant dense<0.000000e+00> : vector<16x32xf32>
    %209 = tpu.matmul %206, %208, %cst_75 {dimension_numbers = #tpu.dot_dimension_numbers<[1], [0], [0], [1], [0, 0, 1, 1], [], []>} : vector<16x64xbf16>, vector<64x32xbf16>, vector<16x32xf32> -> vector<16x32xf32>
    %210 = vector.extract_strided_slice %131 {offsets = [5, 0], sizes = [1, 32], strides = [1, 1]} : vector<8x128xf32> to vector<1x32xf32>
    %211 = vector.broadcast %210 : vector<1x32xf32> to vector<16x32xf32>
    %212 = arith.addf %209, %211 : vector<16x32xf32>
    %213 = arith.addf %196, %212 : vector<16x32xf32>
    %214 = vector.extract_strided_slice %131 {offsets = [6, 0], sizes = [1, 32], strides = [1, 1]} : vector<8x128xf32> to vector<1x32xf32>
    %215 = vector.extract_strided_slice %131 {offsets = [7, 0], sizes = [1, 32], strides = [1, 1]} : vector<8x128xf32> to vector<1x32xf32>
    %cst_76 = arith.constant dense<0.000000e+00> : vector<16xf32>
    %216 = vector.multi_reduction <add>, %213, %cst_76 [1] : vector<16x32xf32> to vector<16xf32>
    %217 = vector.shape_cast %216 : vector<16xf32> to vector<16x1xf32>
    %cst_77 = arith.constant 3.200000e+01 : f32
    %218 = vector.broadcast %cst_77 : f32 to vector<16x1xf32>
    %219 = arith.divf %217, %218 : vector<16x1xf32>
    %220 = vector.broadcast %219 : vector<16x1xf32> to vector<16x32xf32>
    %221 = arith.subf %213, %220 : vector<16x32xf32>
    %222 = arith.mulf %221, %221 : vector<16x32xf32>
    %cst_78 = arith.constant dense<0.000000e+00> : vector<16xf32>
    %223 = vector.multi_reduction <add>, %222, %cst_78 [1] : vector<16x32xf32> to vector<16xf32>
    %224 = vector.shape_cast %223 : vector<16xf32> to vector<16x1xf32>
    %cst_79 = arith.constant 3.200000e+01 : f32
    %225 = vector.broadcast %cst_79 : f32 to vector<16x1xf32>
    %226 = arith.divf %224, %225 : vector<16x1xf32>
    %227 = vector.broadcast %219 : vector<16x1xf32> to vector<16x32xf32>
    %228 = arith.subf %213, %227 : vector<16x32xf32>
    %cst_80 = arith.constant 9.99999974E-6 : f32
    %229 = vector.broadcast %cst_80 : f32 to vector<16x1xf32>
    %230 = arith.addf %226, %229 : vector<16x1xf32>
    %231 = math.rsqrt %230 : vector<16x1xf32>
    %232 = vector.broadcast %231 : vector<16x1xf32> to vector<16x32xf32>
    %233 = arith.mulf %228, %232 : vector<16x32xf32>
    %234 = vector.broadcast %214 : vector<1x32xf32> to vector<16x32xf32>
    %235 = arith.mulf %233, %234 : vector<16x32xf32>
    %236 = vector.broadcast %215 : vector<1x32xf32> to vector<16x32xf32>
    %237 = arith.addf %235, %236 : vector<16x32xf32>
    %238 = arith.truncf %237 : vector<16x32xf32> to vector<16x32xbf16>
    %c0_81 = arith.constant 0 : index
    %c0_82 = arith.constant 0 : index
    %239 = vector.load %arg12[%c0_81, %c0_82] : memref<32x128xbf16, #tpu.memory_space<vmem>>, vector<32x128xbf16>
    %cst_83 = arith.constant dense<0.000000e+00> : vector<16x128xf32>
    %240 = tpu.matmul %238, %239, %cst_83 {dimension_numbers = #tpu.dot_dimension_numbers<[1], [0], [0], [1], [0, 0, 1, 1], [], []>} : vector<16x32xbf16>, vector<32x128xbf16>, vector<16x128xf32> -> vector<16x128xf32>
    %c0_84 = arith.constant 0 : index
    %c0_85 = arith.constant 0 : index
    %241 = vector.load %arg13[%c0_84, %c0_85] : memref<1x128xf32, #tpu.memory_space<vmem>>, vector<1x128xf32>
    %242 = vector.broadcast %241 : vector<1x128xf32> to vector<16x128xf32>
    %243 = arith.addf %240, %242 : vector<16x128xf32>
    %c0_86 = arith.constant 0 : index
    %c0_87 = arith.constant 0 : index
    %244 = vector.load %arg14[%c0_86, %c0_87] : memref<16x128xf32, #tpu.memory_space<vmem>>, vector<16x128xf32>
    tpu.vector_store %arg14[%c0_86, %c0_87], %243 {strides = array<i32>} : memref<16x128xf32, #tpu.memory_space<vmem>>, vector<16x128xf32>,
    return
  }
  func.func @transform_0(%arg0: i32) -> (i32, i32) {
    %c0_i32 = arith.constant 0 : i32
    %c0_i32_0 = arith.constant 0 : i32
    %c0_i32_1 = arith.constant 0 : i32
    return %c0_i32, %c0_i32_0 : i32, i32
  }
  func.func @transform_1(%arg0: i32) -> (i32, i32) {
    %c0_i32 = arith.constant 0 : i32
    %c0_i32_0 = arith.constant 0 : i32
    %c0_i32_1 = arith.constant 0 : i32
    return %c0_i32, %c0_i32_0 : i32, i32
  }
  func.func @transform_2(%arg0: i32) -> (i32, i32) {
    %c0_i32 = arith.constant 0 : i32
    %c0_i32_0 = arith.constant 0 : i32
    %c0_i32_1 = arith.constant 0 : i32
    return %c0_i32, %c0_i32_0 : i32, i32
  }
  func.func @transform_3(%arg0: i32) -> (i32, i32) {
    %c0_i32 = arith.constant 0 : i32
    %c0_i32_0 = arith.constant 0 : i32
    %c0_i32_1 = arith.constant 0 : i32
    return %c0_i32, %c0_i32_0 : i32, i32
  }
  func.func @transform_4(%arg0: i32) -> (i32, i32) {
    %c0_i32 = arith.constant 0 : i32
    %c0_i32_0 = arith.constant 0 : i32
    %c0_i32_1 = arith.constant 0 : i32
    return %c0_i32, %c0_i32_0 : i32, i32
  }
  func.func @transform_5(%arg0: i32) -> (i32, i32) {
    %c0_i32 = arith.constant 0 : i32
    %c0_i32_0 = arith.constant 0 : i32
    %c0_i32_1 = arith.constant 0 : i32
    return %c0_i32, %c0_i32_0 : i32, i32
  }
  func.func @transform_6(%arg0: i32) -> (i32, i32, i32) {
    %c0_i32 = arith.constant 0 : i32
    %c0_i32_0 = arith.constant 0 : i32
    %c0_i32_1 = arith.constant 0 : i32
    %c0_i32_2 = arith.constant 0 : i32
    return %c0_i32, %c0_i32_0, %c0_i32_1 : i32, i32, i32
  }
  func.func @transform_7(%arg0: i32) -> (i32, i32, i32) {
    %c0_i32 = arith.constant 0 : i32
    %c0_i32_0 = arith.constant 0 : i32
    %c0_i32_1 = arith.constant 0 : i32
    %c0_i32_2 = arith.constant 0 : i32
    return %c0_i32, %c0_i32_0, %c0_i32_1 : i32, i32, i32
  }
  func.func @transform_8(%arg0: i32) -> (i32, i32, i32) {
    %c0_i32 = arith.constant 0 : i32
    %c0_i32_0 = arith.constant 0 : i32
    %c0_i32_1 = arith.constant 0 : i32
    %c0_i32_2 = arith.constant 0 : i32
    return %c0_i32, %c0_i32_0, %c0_i32_1 : i32, i32, i32
  }
  func.func @transform_9(%arg0: i32) -> (i32, i32, i32) {
    %c0_i32 = arith.constant 0 : i32
    %c0_i32_0 = arith.constant 0 : i32
    %c0_i32_1 = arith.constant 0 : i32
    %c0_i32_2 = arith.constant 0 : i32
    return %c0_i32, %c0_i32_0, %c0_i32_1 : i32, i32, i32
  }
  func.func @transform_10(%arg0: i32) -> (i32, i32, i32) {
    %c0_i32 = arith.constant 0 : i32
    %c0_i32_0 = arith.constant 0 : i32
    %c0_i32_1 = arith.constant 0 : i32
    %c0_i32_2 = arith.constant 0 : i32
    return %c0_i32, %c0_i32_0, %c0_i32_1 : i32, i32, i32
  }
  func.func @transform_11(%arg0: i32) -> (i32, i32) {
    %c0_i32 = arith.constant 0 : i32
    %c0_i32_0 = arith.constant 0 : i32
    %c0_i32_1 = arith.constant 0 : i32
    return %c0_i32, %c0_i32_0 : i32, i32
  }
  func.func @transform_12(%arg0: i32) -> (i32, i32) {
    %c0_i32 = arith.constant 0 : i32
    %c0_i32_0 = arith.constant 0 : i32
    %c0_i32_1 = arith.constant 0 : i32
    return %c0_i32, %c0_i32_0 : i32, i32
  }
  func.func @transform_13(%arg0: i32) -> (i32, i32) {
    %c0_i32 = arith.constant 0 : i32
    %c0_i32_0 = arith.constant 0 : i32
    %c0_i32_1 = arith.constant 0 : i32
    return %c0_i32, %c0_i32_0 : i32, i32
  }
}

</mosaic_0001>

<bundles_post_ra>
// kernel: transformer_forward.1
= control target key start
LH: loop header
LB: loop body
LE: loop exit
PB: predicated region body
PF: predicated region fallthrough
CT: control target
= control target key end

     0   :  { %v2311_v1 = vmov 0   ;;  %v2312_v2 = vmov 0.0   ;;  %vm2313_vm0 = vmmov 0   ;;  %s2926_s0 = inlined_call_operand.vmem [shape: s32[16,1], index: 0, kind: input, shape index: {}]   ;;  %s2927_s1 = inlined_call_operand.vmem [shape: bf16[64,32], index: 1, kind: input, shape index: {}]   ;;  %s2928_s2 = inlined_call_operand.vmem [shape: f32[16,32], index: 2, kind: input, shape index: {}]   ;;  %s2929_s3 = inlined_call_operand.vmem [shape: f32[64,32], index: 3, kind: input, shape index: {}]   ;;  %s2930_s4 = inlined_call_operand.vmem [shape: s32[64,1], index: 4, kind: input, shape index: {}]   ;;  %s2931_s5 = inlined_call_operand.vmem [shape: s32[1,16], index: 5, kind: input, shape index: {}]   ;;  %s2932_s6 = inlined_call_operand.vmem [shape: bf16[2,32,96], index: 6, kind: input, shape index: {}]   ;;  %s2933_s7 = inlined_call_operand.vmem [shape: bf16[2,32,32], index: 7, kind: input, shape index: {}]   ;;  %s2934_s8 = inlined_call_operand.vmem [shape: bf16[2,32,64], index: 8, kind: input, shape index: {}]   ;;  %s2935_s9 = inlined_call_operand.vmem [shape: bf16[2,64,32], index: 9, kind: input, shape index: {}]   ;;  %s2936_s10 = inlined_call_operand.vmem [shape: f32[2,8,128], index: 10, kind: input, shape index: {}]   ;;  %s2937_s11 = inlined_call_operand.vmem [shape: bf16[32,128], index: 11, kind: input, shape index: {}]   ;;  %s2938_s12 = inlined_call_operand.vmem [shape: f32[1,128], index: 12, kind: input, shape index: {}]   ;;  %s2939_s13 = inlined_call_operand.hbm [shape: f32[16,128], index: 13, kind: output, shape index: {}]  }
   0x1   :  { %v117_v0 = vld [vmem:[%s2926_s0] sm:$0xff]  ;;  %2151 = vset.pattern.permute.xlu0 %v2311_v1  ;;  %1964 = vmatprep.subr.bf16.mxu0 %v2312_v2  ;;  %v118_v4 = vld [vmem:[%s2926_s0 + $0x8] sm:$0xff]  ;;  %v2175_v7 = vld [vmem:[%s2927_s1 + $0x10] sm:$0xff]  }
   0x2   :  { %120 = vperm.xlu0 %2151, %v117_v0   ;;  %v2173_v3 = vld [vmem:[%s2927_s1] sm:$0xff]   ;;  %1976 = vmatprep.subr.bf16.mxu1 %v2312_v2  ;;  %v2174_v5 = vld [vmem:[%s2927_s1 + $0x8] sm:$0xff]   ;;  %v65_v8 = vld [vmem:[%s2930_s4 + $0x18] sm:$0xff] }
   0x3   :  { %2157 = vset.pattern.permute.xlu1 %v2311_v1  ;;  %1965 = vmatpush3.bf16.msra.mxu0 %v2173_v3  ;;  %v63_v6 = vld [vmem:[%s2930_s4 + $0x8] sm:$0xff]  ;;  %v2176_v9 = vld [vmem:[%s2927_s1 + $0x18] sm:$0xff]  }
   0x4   :  { %1966 = vmatprep.subr.bf16.mxu0 %v2312_v2  ;;  %1972 = vmatprep.mubr.msk.bf16.mxu0 %vm2313_vm0, %v2312_v2  ;;  %v67_v10 = vld [vmem:[%s2930_s4 + $0x28] sm:$0xff]  ;;  %v69_v11 = vld [vmem:[%s2930_s4 + $0x38] sm:$0xff] }
   0x5   :  { %1980 = vmatprep.mubr.msk.bf16.mxu1 %vm2313_vm0, %v2312_v2 }
   0x6   :  { %123 = vperm.xlu0 %2151, %v118_v4  }
   0x7   :  { %1967 = vmatpush3.bf16.msra.mxu0 %v2174_v5 }
   0x8   :  { %1968 = vmatprep.subr.bf16.mxu0 %v2312_v2 }
   0xa   :  { %75 = vperm.xlu0 %2151, %v63_v6  }
   0xb   :  { %1969 = vmatpush3.bf16.msra.mxu0 %v2175_v7 }
   0xc   :  { %1970 = vmatprep.subr.bf16.mxu0 %v2312_v2 }
   0xe   :  { %81 = vperm.xlu0 %2151, %v65_v8  }
   0xf   :  { %1971 = vmatpush3.bf16.msra.mxu0 %v2176_v9 }
  0x12   :  { %87 = vperm.xlu0 %2151, %v67_v10  }
  0x16   :  { %93 = vperm.xlu0 %2151, %v69_v11  }
  0x17   :  { %18 = vsyncpa [#allocation3], 0  ;;  %v115_v12 = vlaneseq  ;;  %vm166_vm3 = vcmask 523264   ;;  %v2177_v19 = vld [vmem:[%s2932_s6] sm:$0xff]   ;;  %v2178_v20 = vld [vmem:[%s2932_s6 + $0x8] sm:$0xff]   ;;  %vm233_vm4 = vcmask 261120  }
  0x18   :  { %1977 = vmatpush3.bf16.msra.mxu1 %v2177_v19  ;;  %v140_v21 = vld [vmem:[%s2928_s2] sm:$0xff]  ;;  %v141_v23 = vld [vmem:[%s2928_s2 + $0x8] sm:$0xff]  ;;  %s2314_s20 = smov 96   ;;  %v64_v45 = vld [vmem:[%s2930_s4 + $0x10] sm:$0xff]  ;;  %vm425_vm8 = vcmask 130048   ;;  %s2317_s29 = smov [#allocation2]  }
  0x19   :  { %v116_v13 = vand.u32 127, %v115_v12  ;;  %1978 = vmatprep.subr.bf16.mxu1 %v2312_v2  ;;  %v2452_v30 = vshrl.u32 %v115_v12, 7  ;;  %v2458_v32 = vld [vmem:[%s2936_s10] sm:$0xff]  ;;  %v68_v47 = vld [vmem:[%s2930_s4 + $0x30] sm:$0xff]  ;;  %vm2491_vm5 = vmpackc.low %vm233_vm4, %vm233_vm4 }
  0x1a   :  { %v2463_v33 = vld [vmem:[%s2929_s3] sm:$0xff]  ;;  %v2498_v53 = vld [vmem:[%s2929_s3 + $0x8] sm:$0xff]  ;;  %v2505_v54 = vld [vmem:[%s2929_s3 + $0x10] sm:$0xff] }
  0x1b   :  { %v219_v31 = vsub.s32 0, %v2452_v30  ;;  %v2469_v35 = vmul.f32 0.35355338, %v2463_v33  ;;  %v62_v44 = vld [vmem:[%s2930_s4] sm:$0xff]  ;;  %v2510_v55 = vmul.f32 0.35355338, %v2498_v53 }
  0x1c   :  { %1979 = vmatpush3.bf16.msra.mxu1 %v2178_v20  ;;  %v66_v46 = vld [vmem:[%s2930_s4 + $0x20] sm:$0xff]  ;;  %v2514_v56 = vmul.f32 0.35355338, %v2505_v54  ;;  %v2519_v57 = vld [vmem:[%s2929_s3 + $0x18] sm:$0xff]  ;;  %v2537_v63 = vld [vmem:[%s2929_s3 + $0x28] sm:$0xff] }
  0x1d   :  { %v220_v34 = vrot.slane %v2458_v32, %v219_v31  ;;  %v2524_v58 = vld [vmem:[%s2929_s3 + $0x20] sm:$0xff]  ;;  %v2528_v60 = vmul.f32 0.35355338, %v2519_v57  ;;  %v2543_v0 = vld [vmem:[%s2929_s3 + $0x30] sm:$0xff]  ;;  %v2548_v3 = vmul.f32 0.35355338, %v2537_v63 }
  0x1e   :  { %v2532_v62 = vmul.f32 0.35355338, %v2524_v58  ;;  %v2552_v5 = vmul.f32 0.35355338, %v2543_v0  ;;  %v2557_v6 = vld [vmem:[%s2929_s3 + $0x38] sm:$0xff] }
  0x1f   :  { %v2563_v8 = vmul.f32 0.35355338, %v2557_v6 }
  0x81   :  { %v121_v14 = vpop.permute.xlu0 %120 }
  0x82   :  { %vm125_vm1 = vcmp.eq.s32.totalorder %v116_v13, %v121_v14 }
  0x83   :  { %v1792_v16 = vsel %vm125_vm1, 1.0, %v2312_v2 }
  0x85   :  { %v124_v15 = vpop.permute.xlu0 %123 }
  0x86   :  { %vm126_vm2 = vcmp.eq.s32.totalorder %v116_v13, %v124_v15  ;;  %v1791_v13 = vld [vmem:[%s2931_s5] ss:$0 sm:$0xff]  ;;  %s2316_s5 = smov 64  }
  0x87   :  { %v1793_v17 = vsel %vm126_vm2, 1.0, %v2312_v2 }
  0x88   :  { %v131_v18 = vpack.c.bf16 %v1793_v17, %v1792_v16  ;;  %v2315_v16 = vmov -1e+09  }
  0x89   :  { %v76_v11 = vpop.permute.xlu0 %75 }
  0x8a   :  { %1973 = vmatmul.mubr.msk.bf16.vlgmr.msra.gmra.mrb[0].mxu0 %vm166_vm3, %v131_v18  ;;  %vm100_vm7 = vcmp.eq.s32.totalorder %v76_v11, %v1791_v13 }
  0x8b   :  { %v2577_v19 = vsel %vm100_vm7, 0.0, %v2315_v16 }
  0x8d   :  { %v82_v14 = vpop.permute.xlu0 %81 }
  0x8e   :  { %vm102_vm9 = vcmp.eq.s32.totalorder %v82_v14, %v1791_v13 }
  0x91   :  { %v88_v18 = vpop.permute.xlu0 %87 }
  0x92   :  { %vm104_vm11 = vcmp.eq.s32.totalorder %v88_v18, %v1791_v13 }
 0x15d   :  { %v204_v22 = vpop.f32.mrb[0].mxu0 }
 0x15e   :  { %v1974_v24 = vpop.f32.mrb[1].mxu0  ;;  %v2445_v26 = vadd.f32 %v204_v22, %v140_v21 }
 0x15f   :  { %v207_v25 = vpop.f32.mrb[2].mxu0 }
 0x160   :  { %v2447_v27 = vadd.f32 %v207_v25, %v141_v23  ;;  %v1975_v28 = vpop.f32.mrb[3].mxu0 }
 0x161   :  { %v2582_v28 = vsel %vm102_vm9, 0.0, %v2315_v16 }
 0x162   :  { %v212_v29 = vpack.c.bf16 %v2447_v27, %v2445_v26 }
 0x164   :  { %1981 = vmatmul.mubr.msk.bf16.vlgmr.msra.gmra.mrb[0].mxu1 %vm233_vm4, %v212_v29 }
 0x237   :  { %v271_v36 = vpop.f32.mrb[0].mxu1 }
 0x238   :  { %v272_v37 = vadd.f32 %v271_v36, %v220_v34  ;;  %v1982_v38 = vpop.f32.mrb[1].mxu1 }
 0x239   :  { %v274_v39 = vpop.f32.mrb[2].mxu1 }
 0x23a   :  { %v275_v40 = vadd.f32 %v274_v39, %v220_v34  ;;  %v1983_v41 = vpop.f32.mrb[3].mxu1  ;;  %v278_v42 = vmul.f32 %v272_v37, %v2469_v35  ;;  %v280_v61 = vmul.f32 %v272_v37, %v2514_v56  ;;  %v282_v4 = vmul.f32 %v272_v37, %v2532_v62  ;;  %v94_v39 = vpop.permute.xlu0 %93 }
 0x23b   :  { %v284_v9 = vmul.f32 %v272_v37, %v2552_v5  ;;  %vm106_vm13 = vcmp.eq.s32.totalorder %v94_v39, %v1791_v13 }
 0x23c   :  { %1988 = vmatprep.mubr.msk.f32.mxu1 %vm233_vm4, %v278_v42  ;;  %v2473_v43 = vpack.i.bf16 %v275_v40, %v272_v37  ;;  %v279_v59 = vmul.f32 %v275_v40, %v2510_v55  ;;  %v281_v1 = vmul.f32 %v275_v40, %v2528_v60  ;;  %v283_v7 = vmul.f32 %v275_v40, %v2548_v3 }
 0x23d   :  { %v285_v10 = vmul.f32 %v275_v40, %v2563_v8 }
 0x23e   :  { %2153 = vrot.lane.b32.xlu1 %v2473_v43, %s2314_s20 }
 0x242   :  { %72 = vperm.xlu1 %2157, %v62_v44   ;;  %v2590_v44 = vsel %vm104_vm11, 0.0, %v2315_v16 }
 0x246   :  { %78 = vperm.xlu1 %2157, %v64_v45  }
 0x24a   :  { %84 = vperm.xlu1 %2157, %v66_v46  }
 0x24e   :  { %90 = vperm.xlu1 %2157, %v68_v47  }
 0x2b0   :  { %v2154_v48 = vpop.permute.xlu1 %2153 }
 0x2b1   :  { %v2156_v49 = vunpack.i.h.bf16 %v2154_v48  ;;  %v2155_v50 = vunpack.i.l.bf16 %v2154_v48 }
 0x2b3   :  { %v2120_v52 = vpack.c.bf16 %v2156_v49, %v2155_v50 }
 0x2b5   :  { %2122 = vmatprep.subr.msk.bf16.mxu1 %vm2491_vm5, %v2120_v52 }
 0x2b6   :  { %2125 = vmatpush3.bf16.xpose.msk.msra.mxu1 %vm2491_vm5, %v2120_v52 }
 0x2b7   :  { %2016 = vmatprep.subr.bf16.mxu1 %v2312_v2 }
 0x2bd   :  { %1989 = vmatmul.mubr.msk.f32.vlgmr.msra.gmra.mrb[4].mxu1 %vm233_vm4, %v279_v59  ;;  %v2598_v59 = vsel %vm106_vm13, 0.0, %v2315_v16 }
 0x2be   :  { %1991 = vmatprep.mubr.msk.f32.mxu1 %vm233_vm4, %v280_v61 }
 0x2c1   :  { %1992 = vmatmul.mubr.msk.f32.gmra.mrb[6].mxu1 %vm233_vm4, %v281_v1  ;;  %v73_v12 = vpop.permute.xlu1 %72 }
 0x2c2   :  { %1994 = vmatprep.mubr.msk.f32.mxu1 %vm233_vm4, %v282_v4  ;;  %vm99_vm6 = vcmp.eq.s32.totalorder %v73_v12, %v1791_v13 }
 0x2c3   :  { %v2575_v17 = vsel %vm99_vm6, 0.0, %v2315_v16 }
 0x2c5   :  { %1995 = vmatmul.mubr.msk.f32.gmra.mrb[8].mxu1 %vm233_vm4, %v283_v7  ;;  %v79_v15 = vpop.permute.xlu1 %78 }
 0x2c6   :  { %1997 = vmatprep.mubr.msk.f32.mxu1 %vm233_vm4, %v284_v9  ;;  %vm101_vm10 = vcmp.eq.s32.totalorder %v79_v15, %v1791_v13 }
 0x2c7   :  { %v2586_v37 = vsel %vm101_vm10, 0.0, %v2315_v16 }
 0x2c9   :  { %1998 = vmatmul.mubr.msk.f32.gmra.mrb[10].mxu1 %vm233_vm4, %v285_v10  ;;  %v85_v21 = vpop.permute.xlu1 %84 }
 0x2ca   :  { %2020 = vmatprep.mubr.msk.bf16.mxu1 %vm2313_vm0, %v2312_v2  ;;  %vm103_vm12 = vcmp.eq.s32.totalorder %v85_v21, %v1791_v13 }
 0x2cb   :  { %v2594_v48 = vsel %vm103_vm12, 0.0, %v2315_v16 }
 0x2cd   :  { %v91_v41 = vpop.permute.xlu1 %90 }
 0x2ce   :  { %vm105_vm14 = vcmp.eq.s32.totalorder %v91_v41, %v1791_v13 }
 0x2cf   :  { %v2602_v7 = vsel %vm105_vm14, 0.0, %v2315_v16 }
 0x390   :  { %v1990_v20 = vpop.f32.mrb[4].mxu1 }
 0x391   :  { %v392_v22 = vadd.f32 %v1990_v20, %v2577_v19  ;;  %v386_v23 = vpop.f32.mrb[5].mxu1 }
 0x392   :  { %v387_v24 = vadd.f32 %v386_v23, %v2575_v17 }
 0x393   :  { %v429_v25 = vsel %vm425_vm8, %v392_v22, -inf }
 0x394   :  { %430 = vmax.xlane.f32.xlu0 %v429_v25  ;;  %v1993_v29 = vpop.f32.mrb[6].mxu1  ;;  %v426_v34 = vsel %vm425_vm8, %v387_v24, -inf }
 0x395   :  { %v402_v36 = vadd.f32 %v1993_v29, %v2582_v28  ;;  %v396_v38 = vpop.f32.mrb[7].mxu1  ;;  %427 = vmax.xlane.f32.xlu1 %v426_v34 }
 0x396   :  { %v397_v40 = vadd.f32 %v396_v38, %v2586_v37 }
 0x397   :  { %v435_v42 = vsel %vm425_vm8, %v402_v36, -inf }
 0x398   :  { %v1996_v45 = vpop.f32.mrb[8].mxu1  ;;  %v432_v46 = vsel %vm425_vm8, %v397_v40, -inf }
 0x399   :  { %v412_v47 = vadd.f32 %v1996_v45, %v2590_v44  ;;  %v406_v49 = vpop.f32.mrb[9].mxu1  ;;  %433 = vmax.xlane.f32.xlu0 %v432_v46  ;;  %436 = vmax.xlane.f32.xlu1 %v435_v42 }
 0x39a   :  { %v407_v50 = vadd.f32 %v406_v49, %v2594_v48 }
 0x39b   :  { %v441_v52 = vsel %vm425_vm8, %v412_v47, -inf }
 0x39c   :  { %v1999_v61 = vpop.f32.mrb[10].mxu1  ;;  %v438_v1 = vsel %vm425_vm8, %v407_v50, -inf }
 0x39d   :  { %v422_v4 = vadd.f32 %v1999_v61, %v2598_v59  ;;  %v416_v9 = vpop.f32.mrb[11].mxu1  ;;  %439 = vmax.xlane.f32.xlu0 %v438_v1  ;;  %442 = vmax.xlane.f32.xlu1 %v441_v52 }
 0x39e   :  { %v417_v10 = vadd.f32 %v416_v9, %v2602_v7 }
 0x39f   :  { %v447_v11 = vsel %vm425_vm8, %v422_v4, -inf }
 0x3a0   :  { %v444_v12 = vsel %vm425_vm8, %v417_v10, -inf }
 0x3a1   :  { %445 = vmax.xlane.f32.xlu0 %v444_v12  ;;  %448 = vmax.xlane.f32.xlu1 %v447_v11 }
 0x421   :  { %v431_v13 = vpop.xlane.xlu0 %430 }
 0x422   :  { %v451_v14 = vsub.f32 %v392_v22, %v431_v13  ;;  %v428_v15 = vpop.xlane.xlu1 %427 }
 0x423   :  { %v450_v18 = vsub.f32 %v387_v24, %v428_v15 }
 0x424   :  { %v460_v20 = vmul.f32 1.442695, %v451_v14 }
 0x425   :  { %v458_v21 = vmul.f32 1.442695, %v450_v18 }
 0x426   :  { %2199 = vpow2.f32 %v460_v20  ;;  %v434_v16 = vpop.xlane.xlu0 %433  ;;  %v437_v23 = vpop.xlane.xlu1 %436 }
 0x427   :  { %2201 = vpow2.f32 %v458_v21  ;;  %v452_v25 = vsub.f32 %v397_v40, %v434_v16  ;;  %v453_v29 = vsub.f32 %v402_v36, %v437_v23 }
 0x429   :  { %v462_v34 = vmul.f32 1.442695, %v452_v25  ;;  %v464_v38 = vmul.f32 1.442695, %v453_v29 }
 0x42a   :  { %v440_v39 = vpop.xlane.xlu0 %439  ;;  %v443_v41 = vpop.xlane.xlu1 %442 }
 0x42b   :  { %2203 = vpow2.f32 %v462_v34  ;;  %v454_v42 = vsub.f32 %v407_v50, %v440_v39  ;;  %v455_v45 = vsub.f32 %v412_v47, %v443_v41 }
 0x42c   :  { %2205 = vpow2.f32 %v464_v38 }
 0x42d   :  { %v466_v46 = vmul.f32 1.442695, %v454_v42  ;;  %v468_v22 = vmul.f32 1.442695, %v455_v45 }
 0x42e   :  { %v446_v49 = vpop.xlane.xlu0 %445  ;;  %v449_v24 = vpop.xlane.xlu1 %448 }
 0x42f   :  { %2207 = vpow2.f32 %v466_v46  ;;  %v456_v52 = vsub.f32 %v417_v10, %v446_v49  ;;  %v457_v61 = vsub.f32 %v422_v4, %v449_v24 }
 0x430   :  { %v2200_v1 = vpop.eup %2199  ;;  %2209 = vpow2.f32 %v468_v22 }
 0x431   :  { %v2202_v9 = vpop.eup %2201  ;;  %v470_v40 = vmul.f32 1.442695, %v456_v52  ;;  %v472_v36 = vmul.f32 1.442695, %v457_v61  ;;  %v477_v11 = vsel %vm425_vm8, %v2200_v1, 0.0 }
 0x432   :  { %478 = vadd.xlane.f32.xlu1 %v477_v11  ;;  %v474_v12 = vsel %vm425_vm8, %v2202_v9, 0.0 }
 0x433   :  { %2211 = vpow2.f32 %v470_v40  ;;  %475 = vadd.xlane.f32.xlu0 %v474_v12 }
 0x434   :  { %2213 = vpow2.f32 %v472_v36 }
 0x435   :  { %v2204_v47 = vpop.eup %2203 }
 0x436   :  { %v2206_v50 = vpop.eup %2205  ;;  %v480_v13 = vsel %vm425_vm8, %v2204_v47, 0.0 }
 0x437   :  { %481 = vadd.xlane.f32.xlu0 %v480_v13  ;;  %v483_v4 = vsel %vm425_vm8, %v2206_v50, 0.0 }
 0x438   :  { %484 = vadd.xlane.f32.xlu1 %v483_v4 }
 0x439   :  { %v2208_v10 = vpop.eup %2207 }
 0x43a   :  { %v2210_v14 = vpop.eup %2209  ;;  %v486_v15 = vsel %vm425_vm8, %v2208_v10, 0.0 }
 0x43b   :  { %487 = vadd.xlane.f32.xlu0 %v486_v15  ;;  %v489_v18 = vsel %vm425_vm8, %v2210_v14, 0.0 }
 0x43c   :  { %490 = vadd.xlane.f32.xlu1 %v489_v18 }
 0x43d   :  { %v2212_v20 = vpop.eup %2211 }
 0x43e   :  { %v2214_v21 = vpop.eup %2213  ;;  %v492_v16 = vsel %vm425_vm8, %v2212_v20, 0.0 }
 0x43f   :  { %493 = vadd.xlane.f32.xlu0 %v492_v16  ;;  %v495_v23 = vsel %vm425_vm8, %v2214_v21, 0.0 }
 0x440   :  { %496 = vadd.xlane.f32.xlu1 %v495_v23 }
 0x455   :  { %2159 = vrot.lane.b32.xlu0 %v2473_v43, %s2316_s5 }
 0x4bf   :  { %v479_v29 = vpop.xlane.xlu1 %478 }
 0x4c0   :  { %v476_v25 = vpop.xlane.xlu0 %475 }
 0x4c1   :  { %2215 = vrcp.f32 %v476_v25 }
 0x4c2   :  { %2217 = vrcp.f32 %v479_v29 }
 0x4c4   :  { %v482_v34 = vpop.xlane.xlu0 %481 }
 0x4c5   :  { %v485_v38 = vpop.xlane.xlu1 %484  ;;  %2219 = vrcp.f32 %v482_v34 }
 0x4c6   :  { %2221 = vrcp.f32 %v485_v38 }
 0x4c8   :  { %v488_v39 = vpop.xlane.xlu0 %487 }
 0x4c9   :  { %v491_v46 = vpop.xlane.xlu1 %490  ;;  %2223 = vrcp.f32 %v488_v39 }
 0x4ca   :  { %2225 = vrcp.f32 %v491_v46 }
 0x4cb   :  { %v2216_v41 = vpop.eup %2215 }
 0x4cc   :  { %v494_v42 = vpop.xlane.xlu0 %493  ;;  %v506_v45 = vmul.f32 %v2216_v41, %v2202_v9  ;;  %v2218_v61 = vpop.eup %2217 }
 0x4cd   :  { %2227 = vrcp.f32 %v494_v42  ;;  %v497_v43 = vpop.xlane.xlu1 %496  ;;  %v507_v36 = vmul.f32 %v2218_v61, %v2200_v1 }
 0x4ce   :  { %2004 = vmatprep.mubr.msk.f32.mxu0 %vm425_vm8, %v506_v45  ;;  %2229 = vrcp.f32 %v497_v43 }
 0x4cf   :  { %v2220_v40 = vpop.eup %2219 }
 0x4d0   :  { %v2160_v22 = vpop.permute.xlu0 %2159  ;;  %v2222_v9 = vpop.eup %2221  ;;  %v508_v11 = vmul.f32 %v2220_v40, %v2204_v47 }
 0x4d1   :  { %v2162_v49 = vunpack.i.h.bf16 %v2160_v22  ;;  %v2161_v24 = vunpack.i.l.bf16 %v2160_v22  ;;  %v509_v13 = vmul.f32 %v2222_v9, %v2206_v50  ;;  %v2179_v50 = vld [vmem:[%s2933_s7] sm:$0xff]  }
 0x4d2   :  { %2017 = vmatpush3.bf16.msra.mxu1 %v2179_v50 }
 0x4d3   :  { %v2126_v52 = vpack.c.bf16 %v2162_v49, %v2161_v24  ;;  %v2224_v12 = vpop.eup %2223  ;;  %2018 = vmatprep.subr.bf16.mxu1 %v2312_v2 }
 0x4d4   :  { %v2226_v4 = vpop.eup %2225  ;;  %v510_v15 = vmul.f32 %v2224_v12, %v2208_v10  ;;  %v2180_v10 = vld [vmem:[%s2933_s7 + $0x8] sm:$0xff]  }
 0x4d5   :  { %2127 = vmatprep.subr.bf16.mxu0 %v2126_v52  ;;  %v511_v16 = vmul.f32 %v2226_v4, %v2210_v14 }
 0x4d6   :  { %2129 = vmatpush3.bf16.msra.mxu0 %v2126_v52  ;;  %2019 = vmatpush3.bf16.msra.mxu1 %v2180_v10 }
 0x4d7   :  { %2024 = vmatprep.subr.bf16.mxu0 %v2312_v2  ;;  %v2228_v18 = vpop.eup %2227  ;;  %2032 = vmatprep.subr.bf16.mxu1 %v2312_v2 }
 0x4d8   :  { %v2230_v23 = vpop.eup %2229  ;;  %v512_v1 = vmul.f32 %v2228_v18, %v2212_v20 }
 0x4d9   :  { %2005 = vmatmul.mubr.msk.f32.vlgmr.msra.gmra.mrb[4].mxu0 %vm425_vm8, %v507_v36  ;;  %v513_v47 = vmul.f32 %v2230_v23, %v2214_v21 }
 0x4da   :  { %2007 = vmatprep.mubr.msk.f32.mxu0 %vm425_vm8, %v508_v11 }
 0x4dd   :  { %2008 = vmatmul.mubr.msk.f32.gmra.mrb[6].mxu0 %vm425_vm8, %v509_v13 }
 0x4de   :  { %2010 = vmatprep.mubr.msk.f32.mxu0 %vm425_vm8, %v510_v15 }
 0x4e1   :  { %2011 = vmatmul.mubr.msk.f32.gmra.mrb[8].mxu0 %vm425_vm8, %v511_v16 }
 0x4e2   :  { %2013 = vmatprep.mubr.msk.f32.mxu0 %vm425_vm8, %v512_v1 }
 0x4e5   :  { %2014 = vmatmul.mubr.msk.f32.gmra.mrb[10].mxu0 %vm425_vm8, %v513_v47 }
 0x4e6   :  { %2028 = vmatprep.mubr.msk.bf16.mxu0 %vm2313_vm0, %v2312_v2 }
 0x5ac   :  { %v2006_v14 = vpop.f32.mrb[4].mxu0 }
 0x5ad   :  { %v610_v20 = vpop.f32.mrb[5].mxu0  ;;  %v650_v25 = vmul.f32 %v2006_v14, %v2498_v53 }
 0x5ae   :  { %v649_v38 = vmul.f32 %v610_v20, %v2463_v33 }
 0x5b0   :  { %v2009_v21 = vpop.f32.mrb[6].mxu0 }
 0x5b1   :  { %v652_v29 = vmul.f32 %v2009_v21, %v2519_v57  ;;  %v620_v34 = vpop.f32.mrb[7].mxu0 }
 0x5b2   :  { %v651_v39 = vmul.f32 %v620_v34, %v2505_v54  ;;  %v670_v54 = vsub.s32 1, %v2452_v30  ;;  %v2184_v34 = vld [vmem:[%s2935_s9 + $0x8] sm:$0xff]  }
 0x5b3   :  { %v658_v41 = vadd.f32 %v652_v29, %v650_v25  ;;  %v2182_v25 = vld [vmem:[%s2934_s8 + $0x8] sm:$0xff]   ;;  %v2183_v29 = vld [vmem:[%s2935_s9] sm:$0xff]  }
 0x5b4   :  { %v657_v42 = vadd.f32 %v651_v39, %v649_v38  ;;  %v2012_v45 = vpop.f32.mrb[8].mxu0 }
 0x5b5   :  { %v654_v46 = vmul.f32 %v2012_v45, %v2537_v63  ;;  %v630_v22 = vpop.f32.mrb[9].mxu0 }
 0x5b6   :  { %v653_v49 = vmul.f32 %v630_v22, %v2524_v58  ;;  %v671_v58 = vrot.slane %v2458_v32, %v670_v54  ;;  %v759_v22 = vsub.s32 2, %v2452_v30 }
 0x5b7   :  { %v660_v24 = vadd.f32 %v658_v41, %v654_v46 }
 0x5b8   :  { %v659_v43 = vadd.f32 %v657_v42, %v653_v49  ;;  %v2015_v52 = vpop.f32.mrb[10].mxu0 }
 0x5b9   :  { %v656_v53 = vmul.f32 %v2015_v52, %v2557_v6  ;;  %v640_v61 = vpop.f32.mrb[11].mxu0 }
 0x5ba   :  { %v655_v57 = vmul.f32 %v640_v61, %v2543_v0 }
 0x5bb   :  { %v662_v40 = vadd.f32 %v660_v24, %v656_v53  ;;  %v760_v24 = vrot.slane %v2458_v32, %v759_v22 }
 0x5bc   :  { %v661_v33 = vadd.f32 %v659_v43, %v655_v57  ;;  %v765_v43 = vsub.s32 3, %v2452_v30 }
 0x5be   :  { %v663_v36 = vpack.c.bf16 %v662_v40, %v661_v33  ;;  %v766_v61 = vrot.slane %v2458_v32, %v765_v43 }
 0x5c0   :  { %2021 = vmatmul.mubr.msk.bf16.vlgmr.msra.gmra.mrb[12].mxu1 %vm233_vm4, %v663_v36 }
 0x5c1   :  { %2040 = vmatprep.mubr.msk.bf16.mxu1 %vm2313_vm0, %v2312_v2  ;;  %2033 = vmatpush3.bf16.msra.mxu1 %v2183_v29 }
 0x5c2   :  { %2034 = vmatprep.subr.bf16.mxu1 %v2312_v2 }
 0x5c5   :  { %2035 = vmatpush3.bf16.msra.mxu1 %v2184_v34 }
 0x5c6   :  { %2036 = vmatprep.subr.bf16.mxu1 %v2312_v2 }
 0x693   :  { %v721_v63 = vpop.f32.mrb[12].mxu1 }
 0x694   :  { %v722_v9 = vadd.f32 %v721_v63, %v671_v58  ;;  %v2022_v6 = vpop.f32.mrb[13].mxu1 }
 0x695   :  { %v724_v11 = vpop.f32.mrb[14].mxu1  ;;  %v2186_v6 = vld [vmem:[%s2935_s9 + $0x18] sm:$0xff]  }
 0x696   :  { %v725_v12 = vadd.f32 %v724_v11, %v671_v58  ;;  %v2023_v0 = vpop.f32.mrb[15].mxu1  ;;  %v728_v13 = vadd.f32 %v722_v9, %v2445_v26  ;;  %v2185_v9 = vld [vmem:[%s2935_s9 + $0x10] sm:$0xff]   ;;  %v776_v11 = vsub.s32 4, %v2452_v30 }
 0x697   :  { %2037 = vmatpush3.bf16.msra.mxu1 %v2185_v9 }
 0x698   :  { %v730_v4 = vsel %vm233_vm4, %v728_v13, 0.0  ;;  %v729_v15 = vadd.f32 %v725_v12, %v2447_v27  ;;  %v2181_v27 = vld [vmem:[%s2934_s8] sm:$0xff]   ;;  %2038 = vmatprep.subr.bf16.mxu1 %v2312_v2  ;;  %v777_v12 = vrot.slane %v2458_v32, %v776_v11 }
 0x699   :  { %731 = vadd.xlane.f32.xlu1 %v730_v4  ;;  %2025 = vmatpush3.bf16.msra.mxu0 %v2181_v27 }
 0x69a   :  { %v733_v18 = vsel %vm233_vm4, %v729_v15, 0.0  ;;  %2026 = vmatprep.subr.bf16.mxu0 %v2312_v2 }
 0x69b   :  { %2039 = vmatpush3.bf16.msra.mxu1 %v2186_v6 }
 0x69d   :  { %734 = vadd.xlane.f32.xlu1 %v733_v18  ;;  %2027 = vmatpush3.bf16.msra.mxu0 %v2182_v25 }
 0x69e   :  { %2044 = vmatprep.subr.bf16.mxu0 %v2312_v2 }
 0x726   :  { %v732_v16 = vpop.xlane.xlu1 %731 }
 0x727   :  { %v737_v23 = vmul.f32 0.03125, %v732_v16 }
 0x729   :  { %v739_v1 = vsub.f32 %v728_v13, %v737_v23 }
 0x72a   :  { %v735_v47 = vpop.xlane.xlu1 %734 }
 0x72b   :  { %v738_v50 = vmul.f32 0.03125, %v735_v47  ;;  %v741_v10 = vmul.f32 %v739_v1, %v739_v1 }
 0x72d   :  { %v740_v14 = vsub.f32 %v729_v15, %v738_v50  ;;  %v743_v20 = vsel %vm233_vm4, %v741_v10, 0.0  ;;  %v847_v50 = vsub.s32 5, %v2452_v30 }
 0x72e   :  { %744 = vadd.xlane.f32.xlu1 %v743_v20 }
 0x72f   :  { %v742_v21 = vmul.f32 %v740_v14, %v740_v14  ;;  %v848_v10 = vrot.slane %v2458_v32, %v847_v50 }
 0x731   :  { %v746_v26 = vsel %vm233_vm4, %v742_v21, 0.0 }
 0x732   :  { %747 = vadd.xlane.f32.xlu1 %v746_v26 }
 0x7bb   :  { %v745_v38 = vpop.xlane.xlu1 %744 }
 0x7bc   :  { %v749_v39 = vmul.f32 0.03125, %v745_v38 }
 0x7be   :  { %v751_v41 = vadd.f32 1e-05, %v749_v39 }
 0x7bf   :  { %v748_v42 = vpop.xlane.xlu1 %747 }
 0x7c0   :  { %2231 = vrsqrt.f32 %v751_v41  ;;  %v750_v45 = vmul.f32 0.03125, %v748_v42 }
 0x7c2   :  { %v752_v46 = vadd.f32 1e-05, %v750_v45 }
 0x7c4   :  { %2233 = vrsqrt.f32 %v752_v46 }
 0x7ca   :  { %v2232_v49 = vpop.eup %2231 }
 0x7cb   :  { %v755_v52 = vmul.f32 %v2232_v49, %v739_v1 }
 0x7cd   :  { %v761_v57 = vmul.f32 %v760_v24, %v755_v52 }
 0x7ce   :  { %v2234_v53 = vpop.eup %2233 }
 0x7cf   :  { %v756_v40 = vmul.f32 %v2234_v53, %v740_v14  ;;  %v767_v36 = vadd.f32 %v766_v61, %v761_v57 }
 0x7d1   :  { %v762_v33 = vmul.f32 %v760_v24, %v756_v40  ;;  %v2187_v40 = vld [vmem:[%s2932_s6 + $0x10] sm:$0xff]  }
 0x7d3   :  { %v768_v58 = vadd.f32 %v766_v61, %v762_v33  ;;  %v2188_v33 = vld [vmem:[%s2932_s6 + $0x18] sm:$0xff]  }
 0x7d5   :  { %v769_v63 = vpack.c.bf16 %v768_v58, %v767_v36 }
 0x7d7   :  { %2029 = vmatmul.mubr.msk.bf16.vlgmr.msra.gmra.mrb[12].mxu0 %vm233_vm4, %v769_v63 }
 0x7d8   :  { %2048 = vmatprep.mubr.msk.bf16.mxu0 %vm2313_vm0, %v2312_v2  ;;  %2045 = vmatpush3.bf16.msra.mxu0 %v2187_v40 }
 0x7d9   :  { %2046 = vmatprep.subr.bf16.mxu0 %v2312_v2 }
 0x7dc   :  { %2047 = vmatpush3.bf16.msra.mxu0 %v2188_v33 }
 0x8aa   :  { %v827_v0 = vpop.f32.mrb[12].mxu0 }
 0x8ab   :  { %v828_v13 = vadd.f32 %v827_v0, %v777_v12  ;;  %v2030_v4 = vpop.f32.mrb[13].mxu0  ;;  %v947_v0 = vsub.s32 6, %v2452_v30 }
 0x8ac   :  { %v830_v15 = vpop.f32.mrb[14].mxu0 }
 0x8ad   :  { %v831_v18 = vadd.f32 %v830_v15, %v777_v12  ;;  %v2031_v16 = vpop.f32.mrb[15].mxu0  ;;  %v834_v23 = vmax.f32 %v828_v13, 0.0  ;;  %v948_v4 = vrot.slane %v2458_v32, %v947_v0 }
 0x8af   :  { %v835_v1 = vmax.f32 %v831_v18, 0.0  ;;  %v953_v18 = vsub.s32 7, %v2452_v30 }
 0x8b1   :  { %v836_v47 = vpack.c.bf16 %v835_v1, %v834_v23 }
 0x8b3   :  { %2041 = vmatmul.mubr.msk.bf16.vlgmr.msra.gmra.mrb[16].mxu1 %vm166_vm3, %v836_v47  ;;  %v954_v47 = vrot.slane %v2458_v32, %v953_v18 }
 0x986   :  { %v910_v14 = vpop.f32.mrb[16].mxu1 }
 0x987   :  { %v911_v20 = vadd.f32 %v910_v14, %v848_v10  ;;  %v2042_v21 = vpop.f32.mrb[17].mxu1 }
 0x988   :  { %v913_v26 = vpop.f32.mrb[18].mxu1 }
 0x989   :  { %v914_v27 = vadd.f32 %v913_v26, %v848_v10  ;;  %v2043_v25 = vpop.f32.mrb[19].mxu1  ;;  %v917_v29 = vadd.f32 %v911_v20, %v767_v36  ;;  %v2729_v26 = vld [vmem:[%s2936_s10 + $0x8] sm:$0xff] }
 0x98b   :  { %v919_v34 = vsel %vm233_vm4, %v917_v29, 0.0  ;;  %v918_v38 = vadd.f32 %v914_v27, %v768_v58  ;;  %v968_v27 = vrot.slane %v2729_v26, %v219_v31 }
 0x98c   :  { %920 = vadd.xlane.f32.xlu1 %v919_v34 }
 0x98d   :  { %v922_v39 = vsel %vm233_vm4, %v918_v38, 0.0 }
 0x990   :  { %923 = vadd.xlane.f32.xlu1 %v922_v39 }
 0xa19   :  { %v921_v41 = vpop.xlane.xlu1 %920 }
 0xa1a   :  { %v925_v42 = vmul.f32 0.03125, %v921_v41 }
 0xa1c   :  { %v927_v45 = vsub.f32 %v917_v29, %v925_v42 }
 0xa1d   :  { %v924_v46 = vpop.xlane.xlu1 %923 }
 0xa1e   :  { %v926_v49 = vmul.f32 0.03125, %v924_v46  ;;  %v929_v24 = vmul.f32 %v927_v45, %v927_v45 }
 0xa20   :  { %v928_v52 = vsub.f32 %v918_v38, %v926_v49  ;;  %v931_v53 = vsel %vm233_vm4, %v929_v24, 0.0 }
 0xa21   :  { %932 = vadd.xlane.f32.xlu0 %v931_v53 }
 0xa22   :  { %v930_v61 = vmul.f32 %v928_v52, %v928_v52 }
 0xa24   :  { %v934_v57 = vsel %vm233_vm4, %v930_v61, 0.0 }
 0xa25   :  { %935 = vadd.xlane.f32.xlu1 %v934_v57 }
 0xaae   :  { %v933_v36 = vpop.xlane.xlu0 %932 }
 0xaaf   :  { %v937_v58 = vmul.f32 0.03125, %v933_v36 }
 0xab1   :  { %v939_v63 = vadd.f32 1e-05, %v937_v58 }
 0xab2   :  { %v936_v9 = vpop.xlane.xlu1 %935 }
 0xab3   :  { %2235 = vrsqrt.f32 %v939_v63  ;;  %v938_v6 = vmul.f32 0.03125, %v936_v9 }
 0xab5   :  { %v940_v12 = vadd.f32 1e-05, %v938_v6 }
 0xab7   :  { %2237 = vrsqrt.f32 %v940_v12 }
 0xabd   :  { %v2236_v13 = vpop.eup %2235 }
 0xabe   :  { %v943_v15 = vmul.f32 %v2236_v13, %v927_v45 }
 0xac0   :  { %v949_v23 = vmul.f32 %v948_v4, %v943_v15 }
 0xac1   :  { %v2238_v16 = vpop.eup %2237 }
 0xac2   :  { %v944_v1 = vmul.f32 %v2238_v16, %v928_v52  ;;  %v2719_v14 = vadd.f32 %v954_v47, %v949_v23 }
 0xac4   :  { %v950_v10 = vmul.f32 %v948_v4, %v944_v1 }
 0xac6   :  { %v2721_v20 = vadd.f32 %v954_v47, %v950_v10 }
 0xac8   :  { %v959_v21 = vpack.c.bf16 %v2721_v20, %v2719_v14 }
 0xaca   :  { %2049 = vmatmul.mubr.msk.bf16.vlgmr.msra.gmra.mrb[16].mxu0 %vm233_vm4, %v959_v21 }
 0xb9d   :  { %v1018_v32 = vpop.f32.mrb[16].mxu0 }
 0xb9e   :  { %v1019_v25 = vadd.f32 %v1018_v32, %v968_v27  ;;  %v2050_v29 = vpop.f32.mrb[17].mxu0 }
 0xb9f   :  { %v1021_v34 = vpop.f32.mrb[18].mxu0 }
 0xba0   :  { %v1022_v38 = vadd.f32 %v1021_v34, %v968_v27  ;;  %v2051_v39 = vpop.f32.mrb[19].mxu0  ;;  %v1025_v41 = vmul.f32 %v1019_v25, %v2469_v35  ;;  %v1031_v42 = vmul.f32 %v1019_v25, %v2552_v5  ;;  %v1027_v52 = vmul.f32 %v1019_v25, %v2514_v56 }
 0xba1   :  { %v1029_v61 = vmul.f32 %v1019_v25, %v2532_v62 }
 0xba2   :  { %2056 = vmatprep.mubr.msk.f32.mxu0 %vm233_vm4, %v1025_v41  ;;  %2065 = vmatprep.mubr.msk.f32.mxu1 %vm233_vm4, %v1031_v42  ;;  %v2738_v45 = vpack.i.bf16 %v1022_v38, %v1019_v25  ;;  %v1026_v35 = vmul.f32 %v1022_v38, %v2510_v55  ;;  %v1032_v5 = vmul.f32 %v1022_v38, %v2563_v8 }
 0xba3   :  { %v1028_v53 = vmul.f32 %v1022_v38, %v2528_v60  ;;  %v1030_v51 = vmul.f32 %v1022_v38, %v2548_v3 }
 0xba4   :  { %2164 = vrot.lane.b32.xlu1 %v2738_v45, %s2314_s20 }
 0xc16   :  { %v2165_v31 = vpop.permute.xlu1 %2164 }
 0xc17   :  { %v2167_v46 = vunpack.i.h.bf16 %v2165_v31  ;;  %v2166_v49 = vunpack.i.l.bf16 %v2165_v31 }
 0xc19   :  { %v2130_v24 = vpack.c.bf16 %v2167_v46, %v2166_v49 }
 0xc1b   :  { %2132 = vmatprep.subr.msk.bf16.mxu0 %vm2491_vm5, %v2130_v24  ;;  %2140 = vmatprep.subr.msk.bf16.mxu1 %vm2491_vm5, %v2130_v24 }
 0xc1c   :  { %2135 = vmatpush3.bf16.xpose.msk.msra.mxu0 %vm2491_vm5, %v2130_v24  ;;  %2141 = vmatpush3.bf16.xpose.msk.msra.mxu1 %vm2491_vm5, %v2130_v24 }
 0xc1d   :  { %2084 = vmatprep.subr.bf16.mxu0 %v2312_v2 }
 0xc23   :  { %2057 = vmatmul.mubr.msk.f32.vlgmr.msra.gmra.mrb[20].mxu0 %vm233_vm4, %v1026_v35  ;;  %2066 = vmatmul.mubr.msk.f32.vlgmr.msra.gmra.mrb[20].mxu1 %vm233_vm4, %v1032_v5 }
 0xc24   :  { %2059 = vmatprep.mubr.msk.f32.mxu0 %vm233_vm4, %v1027_v52 }
 0xc27   :  { %2060 = vmatmul.mubr.msk.f32.gmra.mrb[22].mxu0 %vm233_vm4, %v1028_v53 }
 0xc28   :  { %2062 = vmatprep.mubr.msk.f32.mxu0 %vm233_vm4, %v1029_v61 }
 0xc2b   :  { %2063 = vmatmul.mubr.msk.f32.gmra.mrb[24].mxu0 %vm233_vm4, %v1030_v51 }
 0xc2c   :  { %2088 = vmatprep.mubr.msk.bf16.mxu0 %vm2313_vm0, %v2312_v2 }
 0xcf6   :  { %v2058_v55 = vpop.f32.mrb[20].mxu0  ;;  %v2067_v56 = vpop.f32.mrb[20].mxu1 }
 0xcf7   :  { %v1139_v8 = vadd.f32 %v2058_v55, %v2577_v19  ;;  %v1133_v57 = vpop.f32.mrb[21].mxu0  ;;  %v1163_v40 = vpop.f32.mrb[21].mxu1 }
 0xcf8   :  { %v1134_v60 = vadd.f32 %v1133_v57, %v2575_v17 }
 0xcf9   :  { %v1175_v62 = vsel %vm425_vm8, %v1139_v8, -inf }
 0xcfa   :  { %1176 = vmax.xlane.f32.xlu0 %v1175_v62  ;;  %v2061_v33 = vpop.f32.mrb[22].mxu0  ;;  %v1172_v36 = vsel %vm425_vm8, %v1134_v60, -inf }
 0xcfb   :  { %v1149_v3 = vadd.f32 %v2061_v33, %v2582_v28  ;;  %v1143_v58 = vpop.f32.mrb[23].mxu0  ;;  %1173 = vmax.xlane.f32.xlu1 %v1172_v36  ;;  %v1164_v28 = vadd.f32 %v1163_v40, %v2602_v7 }
 0xcfc   :  { %v1144_v63 = vadd.f32 %v1143_v58, %v2586_v37  ;;  %v1169_v37 = vadd.f32 %v2067_v56, %v2598_v59 }
 0xcfd   :  { %v1181_v9 = vsel %vm425_vm8, %v1149_v3, -inf  ;;  %v1190_v16 = vsel %vm425_vm8, %v1164_v28, -inf }
 0xcfe   :  { %1182 = vmax.xlane.f32.xlu0 %v1181_v9  ;;  %v2064_v19 = vpop.f32.mrb[24].mxu0  ;;  %v1178_v17 = vsel %vm425_vm8, %v1144_v63, -inf }
 0xcff   :  { %v1153_v6 = vpop.f32.mrb[25].mxu0  ;;  %v1159_v12 = vadd.f32 %v2064_v19, %v2590_v44  ;;  %v1193_v44 = vsel %vm425_vm8, %v1169_v37, -inf }
 0xd00   :  { %v1154_v13 = vadd.f32 %v1153_v6, %v2594_v48 }
 0xd01   :  { %v1187_v4 = vsel %vm425_vm8, %v1159_v12, -inf }
 0xd02   :  { %1179 = vmax.xlane.f32.xlu0 %v1178_v17  ;;  %v1184_v15 = vsel %vm425_vm8, %v1154_v13, -inf }
 0xd06   :  { %1188 = vmax.xlane.f32.xlu0 %v1187_v4 }
 0xd0a   :  { %1185 = vmax.xlane.f32.xlu0 %v1184_v15 }
 0xd0e   :  { %1191 = vmax.xlane.f32.xlu0 %v1190_v16 }
 0xd12   :  { %1194 = vmax.xlane.f32.xlu0 %v1193_v44 }
 0xd87   :  { %v1177_v23 = vpop.xlane.xlu0 %1176 }
 0xd88   :  { %v1197_v1 = vsub.f32 %v1139_v8, %v1177_v23  ;;  %v1174_v47 = vpop.xlane.xlu1 %1173 }
 0xd89   :  { %v1196_v48 = vsub.f32 %v1134_v60, %v1174_v47 }
 0xd8a   :  { %v1206_v10 = vmul.f32 1.442695, %v1197_v1 }
 0xd8b   :  { %v1204_v21 = vmul.f32 1.442695, %v1196_v48  ;;  %v1183_v27 = vpop.xlane.xlu0 %1182 }
 0xd8c   :  { %2239 = vpow2.f32 %v1206_v10  ;;  %v1199_v7 = vsub.f32 %v1149_v3, %v1183_v27 }
 0xd8d   :  { %2241 = vpow2.f32 %v1204_v21 }
 0xd8e   :  { %v1210_v32 = vmul.f32 1.442695, %v1199_v7 }
 0xd8f   :  { %v1180_v25 = vpop.xlane.xlu0 %1179 }
 0xd90   :  { %2243 = vpow2.f32 %v1210_v32  ;;  %v1198_v49 = vsub.f32 %v1144_v63, %v1180_v25 }
 0xd92   :  { %v1208_v52 = vmul.f32 1.442695, %v1198_v49 }
 0xd93   :  { %v1189_v59 = vpop.xlane.xlu0 %1188 }
 0xd94   :  { %v1201_v29 = vsub.f32 %v1159_v12, %v1189_v59 }
 0xd96   :  { %v2781_v34 = vpop.eup %2239  ;;  %v1214_v38 = vmul.f32 1.442695, %v1201_v29 }
 0xd97   :  { %v2242_v39 = vpop.eup %2241  ;;  %v1186_v41 = vpop.xlane.xlu0 %1185  ;;  %v1223_v42 = vsel %vm425_vm8, %v2781_v34, 0.0 }
 0xd98   :  { %2245 = vpow2.f32 %v1214_v38  ;;  %1224 = vadd.xlane.f32.xlu1 %v1223_v42  ;;  %v1220_v31 = vsel %vm425_vm8, %v2242_v39, 0.0  ;;  %v1200_v53 = vsub.f32 %v1154_v13, %v1186_v41  ;;  %v2189_v42 = vld [vmem:[%s2933_s7 + $0x10] sm:$0xff]  }
 0xd99   :  { %1221 = vadd.xlane.f32.xlu0 %v1220_v31  ;;  %2085 = vmatpush3.bf16.msra.mxu0 %v2189_v42  ;;  %v2190_v31 = vld [vmem:[%s2933_s7 + $0x18] sm:$0xff]   ;;  %s1780_s7 = sshll.u32 %s2317_s29, 4  ;;  %s1781_s7 = int_to_ptr.vmem [resolvable:$true] %s1780_s7 }
 0xd9a   :  { %v2786_v46 = vpop.eup %2243  ;;  %v1212_v8 = vmul.f32 1.442695, %v1200_v53  ;;  %2086 = vmatprep.subr.bf16.mxu0 %v2312_v2  ;;  %v2192_v42 = vld [vmem:[%s2934_s8 + $0x18] sm:$0xff]   ;;  %s2287_s30 = scalar_lea.vmem %s1781_s7, 256  ;;  %p2292_p1 = scmp.lt.s32.totalorder %s1781_s7, %s1781_s7 }
 0xd9b   :  { %v1192_v24 = vpop.xlane.xlu0 %1191  ;;  %v1229_v35 = vsel %vm425_vm8, %v2786_v46, 0.0  ;;  %p2288_p0 = scmp.ne.s32.totalorder %s1781_s7, %s2287_s30  ;;  %p2293_p2 = scmp.lt.s32.totalorder %s2287_s30, %s2287_s30 }
 0xd9c   :  { %v1202_v5 = vsub.f32 %v1164_v28, %v1192_v24  ;;  %1230 = vadd.xlane.f32.xlu1 %v1229_v35  ;;  %v2279_v35 = vld [vmem:[%s2929_s3 + $0x8] sm:$0xff] }
 0xd9d   :  { %2087 = vmatpush3.bf16.msra.mxu0 %v2190_v31  ;;  %v2193_v31 = vld [vmem:[%s2935_s9 + $0x20] sm:$0xff]   ;;  %p2294_p3 = por %p2293_p2, %p2292_p1 }
 0xd9e   :  { %v1216_v61 = vmul.f32 1.442695, %v1202_v5  ;;  %2100 = vmatprep.subr.bf16.mxu0 %v2312_v2 }
 0xd9f   :  { %v1195_v51 = vpop.xlane.xlu0 %1194  ;;  %p2295_p4 = pnand %p2294_p3, %p2288_p0 }
 0xda0   :  { %2247 = vpow2.f32 %v1216_v61  ;;  %v1203_v55 = vsub.f32 %v1169_v37, %v1195_v51  ;;  %v2281_v51 = vld [vmem:[%s2929_s3] sm:$0xff] }
 0xda1   :  { %2249 = vpow2.f32 %v1208_v52  ;;  %v2280_v52 = vld [vmem:[%s2929_s3 + $0x18] sm:$0xff] }
 0xda2   :  { %v2246_v56 = vpop.eup %2245  ;;  %v1218_v57 = vmul.f32 1.442695, %v1203_v55 }
 0xda3   :  { %v1235_v40 = vsel %vm425_vm8, %v2246_v56, 0.0 }
 0xda4   :  { %2251 = vpow2.f32 %v1218_v57  ;;  %1236 = vadd.xlane.f32.xlu1 %v1235_v40 }
 0xda5   :  { %2253 = vpow2.f32 %v1212_v8 }
 0xdaa   :  { %v2248_v60 = vpop.eup %2247 }
 0xdab   :  { %v1238_v62 = vsel %vm425_vm8, %v2248_v60, 0.0  ;;  %v2250_v33 = vpop.eup %2249 }
 0xdac   :  { %1239 = vadd.xlane.f32.xlu0 %v1238_v62  ;;  %v1226_v3 = vsel %vm425_vm8, %v2250_v33, 0.0  ;;  %v2283_v62 = vld [vmem:[%s2929_s3 + $0x28] sm:$0xff] }
 0xdae   :  { %v2252_v36 = vpop.eup %2251 }
 0xdaf   :  { %v1241_v58 = vsel %vm425_vm8, %v2252_v36, 0.0  ;;  %v2254_v63 = vpop.eup %2253 }
 0xdb0   :  { %1227 = vadd.xlane.f32.xlu0 %v1226_v3  ;;  %1242 = vadd.xlane.f32.xlu1 %v1241_v58  ;;  %v1232_v9 = vsel %vm425_vm8, %v2254_v63, 0.0  ;;  %v2284_v3 = vld [vmem:[%s2929_s3 + $0x20] sm:$0xff] }
 0xdb4   :  { %1233 = vadd.xlane.f32.xlu0 %v1232_v9 }
 0xdca   :  { %2169 = vrot.lane.b32.xlu0 %v2738_v45, %s2316_s5 }
 0xe25   :  { %v1225_v13 = vpop.xlane.xlu1 %1224 }
 0xe26   :  { %v1222_v19 = vpop.xlane.xlu0 %1221 }
 0xe27   :  { %2255 = vrcp.f32 %v1222_v19 }
 0xe28   :  { %2257 = vrcp.f32 %v1225_v13  ;;  %v2286_v13 = vld [vmem:[%s2929_s3 + $0x30] sm:$0xff] }
 0xe29   :  { %v1231_v28 = vpop.xlane.xlu1 %1230 }
 0xe31   :  { %v2256_v6 = vpop.eup %2255  ;;  %v1237_v37 = vpop.xlane.xlu1 %1236 }
 0xe32   :  { %v1252_v12 = vmul.f32 %v2256_v6, %v2242_v39  ;;  %v2258_v47 = vpop.eup %2257  ;;  %v2285_v6 = vld [vmem:[%s2929_s3 + $0x38] sm:$0xff] }
 0xe33   :  { %v1253_v10 = vmul.f32 %v2258_v47, %v2781_v34 }
 0xe34   :  { %2072 = vmatprep.mubr.msk.f32.mxu1 %vm425_vm8, %v1252_v12 }
 0xe39   :  { %v1240_v17 = vpop.xlane.xlu0 %1239 }
 0xe3d   :  { %v1228_v4 = vpop.xlane.xlu0 %1227  ;;  %v1243_v45 = vpop.xlane.xlu1 %1242 }
 0xe3e   :  { %2259 = vrcp.f32 %v1228_v4 }
 0xe3f   :  { %2261 = vrcp.f32 %v1231_v28 }
 0xe41   :  { %v1234_v15 = vpop.xlane.xlu0 %1233 }
 0xe42   :  { %2263 = vrcp.f32 %v1234_v15 }
 0xe43   :  { %2265 = vrcp.f32 %v1237_v37 }
 0xe44   :  { %2267 = vrcp.f32 %v1240_v17 }
 0xe45   :  { %v2170_v16 = vpop.permute.xlu0 %2169  ;;  %2269 = vrcp.f32 %v1243_v45 }
 0xe46   :  { %v2172_v44 = vunpack.i.h.bf16 %v2170_v16  ;;  %v2171_v23 = vunpack.i.l.bf16 %v2170_v16  ;;  %v1418_v16 = vrot.slane %v2729_v26, %v670_v54 }
 0xe48   :  { %v2136_v1 = vpack.c.bf16 %v2172_v44, %v2171_v23  ;;  %v2260_v48 = vpop.eup %2259 }
 0xe49   :  { %v2262_v21 = vpop.eup %2261  ;;  %v1254_v27 = vmul.f32 %v2260_v48, %v2250_v33 }
 0xe4a   :  { %2137 = vmatprep.subr.bf16.mxu1 %v2136_v1  ;;  %v1255_v32 = vmul.f32 %v2262_v21, %v2786_v46 }
 0xe4b   :  { %2139 = vmatpush3.bf16.msra.mxu1 %v2136_v1 }
 0xe4c   :  { %2092 = vmatprep.subr.bf16.mxu1 %v2312_v2  ;;  %v2264_v7 = vpop.eup %2263 }
 0xe4d   :  { %v2266_v25 = vpop.eup %2265  ;;  %v1256_v59 = vmul.f32 %v2264_v7, %v2254_v63 }
 0xe4e   :  { %2073 = vmatmul.mubr.msk.f32.vlgmr.msra.gmra.mrb[22].mxu1 %vm425_vm8, %v1253_v10  ;;  %v2268_v29 = vpop.eup %2267  ;;  %v1257_v38 = vmul.f32 %v2266_v25, %v2246_v56  ;;  %v2282_v56 = vld [vmem:[%s2929_s3 + $0x10] sm:$0xff] }
 0xe4f   :  { %2075 = vmatprep.mubr.msk.f32.mxu1 %vm425_vm8, %v1254_v27  ;;  %v2270_v34 = vpop.eup %2269  ;;  %v1258_v39 = vmul.f32 %v2268_v29, %v2248_v60 }
 0xe50   :  { %v1259_v41 = vmul.f32 %v2270_v34, %v2252_v36 }
 0xe52   :  { %2076 = vmatmul.mubr.msk.f32.gmra.mrb[24].mxu1 %vm425_vm8, %v1255_v32 }
 0xe53   :  { %2078 = vmatprep.mubr.msk.f32.mxu1 %vm425_vm8, %v1256_v59 }
 0xe56   :  { %2079 = vmatmul.mubr.msk.f32.gmra.mrb[26].mxu1 %vm425_vm8, %v1257_v38 }
 0xe57   :  { %2081 = vmatprep.mubr.msk.f32.mxu1 %vm425_vm8, %v1258_v39 }
 0xe5a   :  { %2082 = vmatmul.mubr.msk.f32.gmra.mrb[28].mxu1 %vm425_vm8, %v1259_v41 }
 0xe5b   :  { %2096 = vmatprep.mubr.msk.bf16.mxu1 %vm2313_vm0, %v2312_v2 }
 0xf21   :  { %v2074_v46 = vpop.f32.mrb[22].mxu1 }
 0xf22   :  { %v1356_v49 = vpop.f32.mrb[23].mxu1  ;;  %v1396_v5 = vmul.f32 %v2279_v35, %v2074_v46  ;;  %v2194_v46 = vld [vmem:[%s2935_s9 + $0x28] sm:$0xff]  }
 0xf23   :  { %v1395_v55 = vmul.f32 %v2281_v51, %v1356_v49  ;;  %v1506_v51 = vrot.slane %v2729_v26, %v759_v22  ;;  %v2195_v22 = vld [vmem:[%s2935_s9 + $0x30] sm:$0xff]  }
 0xf25   :  { %v2077_v24 = vpop.f32.mrb[24].mxu1 }
 0xf26   :  { %v1398_v53 = vmul.f32 %v2280_v52, %v2077_v24  ;;  %v1366_v61 = vpop.f32.mrb[25].mxu1 }
 0xf27   :  { %v1397_v8 = vmul.f32 %v2282_v56, %v1366_v61 }
 0xf28   :  { %v1404_v57 = vadd.f32 %v1398_v53, %v1396_v5 }
 0xf29   :  { %v1403_v40 = vadd.f32 %v1397_v8, %v1395_v55  ;;  %v2080_v60 = vpop.f32.mrb[26].mxu1  ;;  %v1512_v8 = vrot.slane %v2729_v26, %v765_v43  ;;  %v2196_v43 = vld [vmem:[%s2935_s9 + $0x38] sm:$0xff]  }
 0xf2a   :  { %v1400_v33 = vmul.f32 %v2283_v62, %v2080_v60  ;;  %v1376_v36 = vpop.f32.mrb[27].mxu1 }
 0xf2b   :  { %v1399_v58 = vmul.f32 %v2284_v3, %v1376_v36  ;;  %v1524_v3 = vrot.slane %v2729_v26, %v776_v11 }
 0xf2c   :  { %v1406_v63 = vadd.f32 %v1404_v57, %v1400_v33 }
 0xf2d   :  { %v1405_v9 = vadd.f32 %v1403_v40, %v1399_v58  ;;  %v2083_v19 = vpop.f32.mrb[28].mxu1 }
 0xf2e   :  { %v1402_v12 = vmul.f32 %v2285_v6, %v2083_v19  ;;  %v1386_v17 = vpop.f32.mrb[29].mxu1 }
 0xf2f   :  { %v1401_v4 = vmul.f32 %v2286_v13, %v1386_v17 }
 0xf30   :  { %v1408_v28 = vadd.f32 %v1406_v63, %v1402_v12 }
 0xf31   :  { %v1407_v15 = vadd.f32 %v1405_v9, %v1401_v4 }
 0xf33   :  { %v1409_v37 = vpack.c.bf16 %v1408_v28, %v1407_v15  ;;  %v1596_v28 = vrot.slane %v2729_v26, %v847_v50 }
 0xf35   :  { %2089 = vmatmul.mubr.msk.bf16.vlgmr.msra.gmra.mrb[28].mxu0 %vm233_vm4, %v1409_v37 }
 0xf36   :  { %2108 = vmatprep.mubr.msk.bf16.mxu0 %vm2313_vm0, %v2312_v2  ;;  %2101 = vmatpush3.bf16.msra.mxu0 %v2193_v31 }
 0xf37   :  { %2102 = vmatprep.subr.bf16.mxu0 %v2312_v2 }
 0xf3a   :  { %2103 = vmatpush3.bf16.msra.mxu0 %v2194_v46 }
 0xf3b   :  { %2104 = vmatprep.subr.bf16.mxu0 %v2312_v2 }
 0xf3e   :  { %2105 = vmatpush3.bf16.msra.mxu0 %v2195_v22 }
 0xf3f   :  { %2106 = vmatprep.subr.bf16.mxu0 %v2312_v2 }
 0xf42   :  { %2107 = vmatpush3.bf16.msra.mxu0 %v2196_v43 }
0x1008   :  { %v1468_v44 = vpop.f32.mrb[28].mxu0 }
0x1009   :  { %v1469_v23 = vadd.f32 %v1468_v44, %v1418_v16  ;;  %v2090_v45 = vpop.f32.mrb[29].mxu0 }
0x100a   :  { %v1471_v1 = vpop.f32.mrb[30].mxu0 }
0x100b   :  { %v1472_v47 = vadd.f32 %v1471_v1, %v1418_v16  ;;  %v2091_v48 = vpop.f32.mrb[31].mxu0  ;;  %v1475_v10 = vadd.f32 %v1469_v23, %v2719_v14 }
0x100d   :  { %v1477_v21 = vsel %vm233_vm4, %v1475_v10, 0.0  ;;  %v1476_v27 = vadd.f32 %v1472_v47, %v2721_v20  ;;  %v2191_v20 = vld [vmem:[%s2934_s8 + $0x10] sm:$0xff]  }
0x100e   :  { %1478 = vadd.xlane.f32.xlu1 %v1477_v21  ;;  %2093 = vmatpush3.bf16.msra.mxu1 %v2191_v20 }
0x100f   :  { %v1480_v7 = vsel %vm233_vm4, %v1476_v27, 0.0  ;;  %2094 = vmatprep.subr.bf16.mxu1 %v2312_v2 }
0x1012   :  { %1481 = vadd.xlane.f32.xlu1 %v1480_v7  ;;  %2095 = vmatpush3.bf16.msra.mxu1 %v2192_v42 }
0x1013   :  { %2112 = vmatprep.subr.bf16.mxu1 %v2312_v2 }
0x109b   :  { %v1479_v32 = vpop.xlane.xlu1 %1478 }
0x109c   :  { %v1483_v25 = vmul.f32 0.03125, %v1479_v32 }
0x109e   :  { %v1485_v59 = vsub.f32 %v1475_v10, %v1483_v25 }
0x109f   :  { %v1482_v54 = vpop.xlane.xlu1 %1481 }
0x10a0   :  { %v1484_v29 = vmul.f32 0.03125, %v1482_v54  ;;  %v1487_v38 = vmul.f32 %v1485_v59, %v1485_v59 }
0x10a2   :  { %v1486_v34 = vsub.f32 %v1476_v27, %v1484_v29  ;;  %v1489_v39 = vsel %vm233_vm4, %v1487_v38, 0.0  ;;  %v2197_v38 = vld [vmem:[%s2937_s11] sm:$0xff]  }
0x10a3   :  { %1490 = vadd.xlane.f32.xlu1 %v1489_v39 }
0x10a4   :  { %v1488_v41 = vmul.f32 %v1486_v34, %v1486_v34 }
0x10a6   :  { %v1492_v14 = vsel %vm233_vm4, %v1488_v41, 0.0 }
0x10a7   :  { %1493 = vadd.xlane.f32.xlu1 %v1492_v14 }
0x1130   :  { %v1491_v49 = vpop.xlane.xlu1 %1490 }
0x1131   :  { %v1495_v24 = vmul.f32 0.03125, %v1491_v49  ;;  %v1696_v49 = vrot.slane %v2729_v26, %v947_v0 }
0x1133   :  { %v1497_v35 = vadd.f32 1e-05, %v1495_v24 }
0x1134   :  { %v1494_v5 = vpop.xlane.xlu1 %1493 }
0x1135   :  { %2271 = vrsqrt.f32 %v1497_v35  ;;  %v1496_v52 = vmul.f32 0.03125, %v1494_v5 }
0x1137   :  { %v1498_v53 = vadd.f32 1e-05, %v1496_v52 }
0x1139   :  { %2273 = vrsqrt.f32 %v1498_v53 }
0x113f   :  { %v2272_v61 = vpop.eup %2271 }
0x1140   :  { %v1501_v55 = vmul.f32 %v2272_v61, %v1485_v59 }
0x1142   :  { %v1507_v57 = vmul.f32 %v1506_v51, %v1501_v55 }
0x1143   :  { %v2274_v56 = vpop.eup %2273 }
0x1144   :  { %v1502_v40 = vmul.f32 %v2274_v56, %v1486_v34  ;;  %v1513_v62 = vadd.f32 %v1512_v8, %v1507_v57  ;;  %v2198_v34 = vld [vmem:[%s2937_s11 + $0x8] sm:$0xff]   ;;  %v1884_v56 = vld [vmem:[%s2938_s12] ss:$0 sm:$0xff] }
0x1146   :  { %v1508_v60 = vmul.f32 %v1506_v51, %v1502_v40 }
0x1148   :  { %v1514_v33 = vadd.f32 %v1512_v8, %v1508_v60 }
0x114a   :  { %v1515_v36 = vpack.c.bf16 %v1514_v33, %v1513_v62 }
0x114c   :  { %2097 = vmatmul.mubr.msk.bf16.vlgmr.msra.gmra.mrb[32].mxu1 %vm233_vm4, %v1515_v36 }
0x114d   :  { %2116 = vmatprep.mubr.msk.bf16.mxu1 %vm2313_vm0, %v2312_v2  ;;  %2113 = vmatpush3.bf16.msra.mxu1 %v2197_v38 }
0x114e   :  { %2114 = vmatprep.subr.bf16.mxu1 %v2312_v2  ;;  %v1702_v2 = vrot.slane %v2729_v26, %v953_v18 }
0x1151   :  { %2115 = vmatpush3.bf16.msra.mxu1 %v2198_v34 }
0x121f   :  { %v1574_v58 = vpop.f32.mrb[32].mxu1 }
0x1220   :  { %v1575_v63 = vadd.f32 %v1574_v58, %v1524_v3  ;;  %v2098_v9 = vpop.f32.mrb[33].mxu1 }
0x1221   :  { %v1577_v19 = vpop.f32.mrb[34].mxu1 }
0x1222   :  { %v1578_v6 = vadd.f32 %v1577_v19, %v1524_v3  ;;  %v2099_v12 = vpop.f32.mrb[35].mxu1  ;;  %v1581_v17 = vmax.f32 %v1575_v63, 0.0 }
0x1224   :  { %v1582_v13 = vmax.f32 %v1578_v6, 0.0 }
0x1226   :  { %v1583_v4 = vpack.c.bf16 %v1582_v13, %v1581_v17 }
0x1228   :  { %2109 = vmatmul.mubr.msk.bf16.vlgmr.msra.gmra.mrb[32].mxu0 %vm166_vm3, %v1583_v4 }
0x12fb   :  { %v1658_v15 = vpop.f32.mrb[32].mxu0 }
0x12fc   :  { %v1659_v37 = vadd.f32 %v1658_v15, %v1596_v28  ;;  %v2110_v16 = vpop.f32.mrb[33].mxu0 }
0x12fd   :  { %v1661_v44 = vpop.f32.mrb[34].mxu0 }
0x12fe   :  { %v1662_v11 = vadd.f32 %v1661_v44, %v1596_v28  ;;  %v2111_v23 = vpop.f32.mrb[35].mxu0  ;;  %v1665_v45 = vadd.f32 %v1659_v37, %v1513_v62 }
0x1300   :  { %v1667_v1 = vsel %vm233_vm4, %v1665_v45, 0.0  ;;  %v1666_v47 = vadd.f32 %v1662_v11, %v1514_v33 }
0x1301   :  { %1668 = vadd.xlane.f32.xlu1 %v1667_v1 }
0x1302   :  { %v1670_v48 = vsel %vm233_vm4, %v1666_v47, 0.0 }
0x1305   :  { %1671 = vadd.xlane.f32.xlu1 %v1670_v48 }
0x138e   :  { %v1669_v10 = vpop.xlane.xlu1 %1668 }
0x138f   :  { %v1673_v21 = vmul.f32 0.03125, %v1669_v10 }
0x1391   :  { %v1675_v27 = vsub.f32 %v1665_v45, %v1673_v21 }
0x1392   :  { %v1672_v7 = vpop.xlane.xlu1 %1671 }
0x1393   :  { %v1674_v32 = vmul.f32 0.03125, %v1672_v7  ;;  %v1677_v50 = vmul.f32 %v1675_v27, %v1675_v27 }
0x1395   :  { %v1676_v25 = vsub.f32 %v1666_v47, %v1674_v32  ;;  %v1679_v59 = vsel %vm233_vm4, %v1677_v50, 0.0 }
0x1396   :  { %1680 = vadd.xlane.f32.xlu0 %v1679_v59 }
0x1397   :  { %v1678_v54 = vmul.f32 %v1676_v25, %v1676_v25 }
0x1399   :  { %v1682_v29 = vsel %vm233_vm4, %v1678_v54, 0.0 }
0x139a   :  { %1683 = vadd.xlane.f32.xlu1 %v1682_v29 }
0x1423   :  { %v1681_v39 = vpop.xlane.xlu0 %1680 }
0x1424   :  { %v1685_v41 = vmul.f32 0.03125, %v1681_v39 }
0x1426   :  { %v1687_v14 = vadd.f32 1e-05, %v1685_v41 }
0x1427   :  { %v1684_v20 = vpop.xlane.xlu1 %1683 }
0x1428   :  { %2275 = vrsqrt.f32 %v1687_v14  ;;  %v1686_v42 = vmul.f32 0.03125, %v1684_v20 }
0x142a   :  { %v1688_v31 = vadd.f32 1e-05, %v1686_v42 }
0x142c   :  { %2277 = vrsqrt.f32 %v1688_v31 }
0x1432   :  { %v2276_v46 = vpop.eup %2275 }
0x1433   :  { %v1691_v24 = vmul.f32 %v2276_v46, %v1675_v27 }
0x1435   :  { %v1697_v5 = vmul.f32 %v1696_v49, %v1691_v24 }
0x1436   :  { %v2278_v35 = vpop.eup %2277 }
0x1437   :  { %v1692_v52 = vmul.f32 %v2278_v35, %v1676_v25  ;;  %v1703_v61 = vadd.f32 %v1702_v2, %v1697_v5 }
0x1439   :  { %v1698_v53 = vmul.f32 %v1696_v49, %v1692_v52 }
0x143b   :  { %v1704_v51 = vadd.f32 %v1702_v2, %v1698_v53 }
0x143d   :  { %v1705_v55 = vpack.c.bf16 %v1704_v51, %v1703_v61 }
0x143f   :  { %2117 = vmatmul.mubr.msk.bf16.vlgmr.msra.gmra.mrb[36].mxu1 %vm233_vm4, %v1705_v55 }
0x1512   :  { %v1766_v8 = vpop.f32.mrb[36].mxu1 }
0x1513   :  { %v1767_v0 = vadd.f32 %v1884_v56, %v1766_v8  ;;  %v2118_v57 = vpop.f32.mrb[37].mxu1 }
0x1514   :  { %v1769_v40 = vpop.f32.mrb[38].mxu1 }
0x1515   :  { %1773 = vst [vmem:[#allocation2] sm:$0xff] %v1767_v0  ;;  %v1770_v30 = vadd.f32 %v1884_v56, %v1769_v40  ;;  %v2119_v60 = vpop.f32.mrb[39].mxu1 }
0x1517   :  { %1774 = vst [vmem:[#allocation2 + $0x8] sm:$0xff] %v1770_v30 }
0x1518   :  { %2298 = shalt.err (!%p2295_p4)
}
0x1519   :  { %s2299_s15 = scalar_lea.hbm %s2939_s13, 256 }
0x151a   :  { %p2300_p5 = scmp.ne.s32.totalorder %s2939_s13, %s2299_s15  ;;  %p2303_p6 = scmp.lt.u32.totalorder %s2299_s15, %s2939_s13 }
0x151c   :  { %p2305_p7 = pnand %p2303_p6, %p2300_p5 }
0x151e   :  { %2308 = shalt.err (!%p2305_p7)
}
0x151f   :  { %s2318_s19 = smov 128   ;;  %s2319_s0 = smov 8  }
0x1520   :  { %1786 = dma.vmem_to_hbm [thread:$0]  %s1781_s7, 256, %s2939_s13, [#allocation3], %s2318_s19, %s2318_s19, %s2319_s0  }
0x1521   :  { %2309 = dma.done.wait [#allocation3], 256  }
0x1522   :  { %2310 = vsyncadd [#allocation3], 4294967040 }
0x1523   :  { %1790 = vsyncpa [#allocation3], 1 }

</bundles_post_ra>
